<compile_context>
chip_gen: v6e
topology: v6e:2x2x1
jax: 0.10.0
libtpu: 0.0.40
codegen_flags: <defaults>
</compile_context>

<pallas_src>
import jax
import jax.numpy as jnp
from jax import lax
from jax.experimental import pallas as pl
from jax.experimental.pallas import tpu as pltpu


def _round_up(x, m):
    return (x + m - 1) // m * m


def _largest_divisor_leq(n, cap):
    for d in range(min(n, cap), 0, -1):
        if n % d == 0:
            return d
    return 1


def _skip_gru_kernel(gi_ref, h0_ref, zc_ref, ghc_ref, wlh_ref, wcomb_ref,
                     out_ref, hT_ref, h_scr):
    """Grid = (batch_tiles, time_chunks); one invocation runs Tc timesteps."""
    c = pl.program_id(1)                      # time-chunk index (sequential axis)
    Hp = h_scr.shape[-1]
    Tc = gi_ref.shape[0]

    @pl.when(c == 0)
    def _():
        h_scr[...] = h0_ref[...].astype(jnp.float32)

    # Loop invariants: load once per grid step (covers Tc timesteps).
    zc = zc_ref[...]                          # (Bt, Hp)   f32
    ghc = ghc_ref[...]                        # (Bt, 3Hp)  f32
    wlh = wlh_ref[...]                        # (Hp, Hp)   weight dtype
    wcomb = wcomb_ref[...]                    # (Hp, 3Hp)  weight dtype

    def step(i, h):
        h_c = h.astype(wlh.dtype)
        # Two INDEPENDENT dots from ht -> MXU can pipeline them back-to-back.
        ht_hat = jnp.dot(h_c, wlh, preferred_element_type=jnp.float32) + zc
        gh = jnp.dot(h_c, wcomb, preferred_element_type=jnp.float32) + ghc
        gi = gi_ref[i]                        # (Bt, 3Hp) f32, precomputed x-proj
        r = jax.nn.sigmoid(gi[:, 0 * Hp:1 * Hp] + gh[:, 0 * Hp:1 * Hp])
        zg = jax.nn.sigmoid(gi[:, 1 * Hp:2 * Hp] + gh[:, 1 * Hp:2 * Hp])
        n = jnp.tanh(gi[:, 2 * Hp:3 * Hp] + r * gh[:, 2 * Hp:3 * Hp])
        h_new = (1.0 - zg) * n + zg * ht_hat
        out_ref[i] = h_new.astype(out_ref.dtype)
        return h_new

    h_final = lax.fori_loop(0, Tc, step, h_scr[...], unroll=True)
    h_scr[...] = h_final

    @pl.when(c == pl.num_programs(1) - 1)     # write final hidden state only once
    def _():
        hT_ref[...] = h_final.astype(hT_ref.dtype)


def skip_gru_forward(inputs, h0, z, params, *, weight_dtype=jnp.float32,
                     time_chunk=16, time_major_output=False):
    """inputs: (B, T, I), h0: (B, H), z: (B, L).

    Returns (outputs, hT); outputs is (B, T, H), or (T, B, H) when
    time_major_output=True (skips the wrapper-side HBM transpose)."""
    B, T, I = inputs.shape
    H = h0.shape[-1]
    L = z.shape[-1]
    f32 = jnp.float32

    w_lin = params["w_lin"].astype(f32)       # (H, H+L)
    b_lin = params["b_lin"].astype(f32)       # (H,)
    w_ih = params["w_ih"].astype(f32)         # (3H, I)
    w_hh = params["w_hh"].astype(f32)         # (3H, H)
    b_ih = params["b_ih"].astype(f32)         # (3H,)
    b_hh = params["b_hh"].astype(f32)         # (3H,)

    # ---- TPU-friendly padded sizes --------------------------------------
    Hp = _round_up(H, 128)                    # lane-aligned hidden size
    n_btiles = 2 if B > 8 else 1              # >=2 tiles -> v7x megacore split
    Bt = _round_up(-(-B // n_btiles), 8)      # sublane-aligned batch tile
    Bp = Bt * n_btiles
    Tc = _largest_divisor_leq(T, time_chunk)  # timesteps per grid step

    # ---- loop-invariant precompute (wrapper-side XLA, not the hot loop) --
    # Pad gate weights per-gate so gate k occupies lanes [k*Hp, k*Hp + H).
    def pad_gates_t(w, in_dim, in_pad):       # w: (3H, in) -> (in_pad, 3*Hp)
        wt = jnp.transpose(w).reshape(in_dim, 3, H)
        wt = jnp.pad(wt, ((0, in_pad - in_dim), (0, 0), (0, Hp - H)))
        return wt.reshape(in_pad, 3 * Hp)

    wlh_t = jnp.zeros((Hp, Hp), f32).at[:H, :H].set(jnp.transpose(w_lin[:, :H]))
    wlz_t = jnp.transpose(w_lin[:, H:])                        # (L, H)
    whh_t = pad_gates_t(w_hh, H, Hp)                           # (Hp, 3Hp)
    wih_t = pad_gates_t(w_ih, I, I)                            # (I, 3Hp)
    b_ih_p = jnp.pad(b_ih.reshape(3, H), ((0, 0), (0, Hp - H))).reshape(3 * Hp)
    b_hh_p = jnp.pad(b_hh.reshape(3, H), ((0, 0), (0, Hp - H))).reshape(3 * Hp)

    # z-part of Linear(concat(ht, z)) + bias: loop invariant, hoisted.
    zc_s = z.astype(f32) @ wlz_t + b_lin                       # (B, H)
    zc = jnp.zeros((Bp, Hp), f32).at[:B, :H].set(zc_s)

    # gh = ht_hat @ W_hh^T + b_hh  ==  ht @ W_comb + gh_const
    w_comb = (wlh_t @ whh_t).astype(weight_dtype)              # (Hp, 3Hp)
    gh_const = zc @ whh_t + b_hh_p                             # (Bp, 3Hp)

    # Input projection for ALL timesteps as ONE big matmul (time-major slab).
    x_tbi = jnp.transpose(inputs.astype(f32), (1, 0, 2))       # (T, B, I)
    x_tbi = jnp.pad(x_tbi, ((0, 0), (0, Bp - B), (0, 0)))      # (T, Bp, I)
    gi_all = jnp.einsum("tbi,ig->tbg", x_tbi, wih_t) + b_ih_p  # (T, Bp, 3Hp)

    h0_p = jnp.zeros((Bp, Hp), f32).at[:B, :H].set(h0.astype(f32))
    wlh_k = wlh_t.astype(weight_dtype)

    # ---- explicit VMEM budget (bf16 weights keep v7x's 64 MiB happy) ----
    wbytes = jnp.dtype(weight_dtype).itemsize
    vmem_bytes = (
        2 * Tc * Bt * 4 * (3 * Hp + Hp)              # gi + out blocks (double-buffered)
        + 2 * Bt * 4 * (Hp + Hp + 3 * Hp + Hp)       # h0, zc, gh_const, hT
        + 2 * wbytes * (Hp * Hp + Hp * 3 * Hp)       # W_lh^T, W_comb
        + Bt * Hp * 4                                # hidden-state scratch
    )
    vmem_limit = int(min(60 << 20, max(vmem_bytes + (2 << 20), 16 << 20)))

    const2 = lambda b, c: (b, 0)
    wconst = lambda b, c: (0, 0)
    grid_spec = pltpu.PrefetchScalarGridSpec(
        num_scalar_prefetch=0,
        grid=(n_btiles, T // Tc),
        in_specs=[
            pl.BlockSpec((Tc, Bt, 3 * Hp), lambda b, c: (c, b, 0)),  # gi chunk
            pl.BlockSpec((Bt, Hp), const2),                          # h0
            pl.BlockSpec((Bt, Hp), const2),                          # zc
            pl.BlockSpec((Bt, 3 * Hp), const2),                      # gh_const
            pl.BlockSpec((Hp, Hp), wconst),                          # W_lh^T
            pl.BlockSpec((Hp, 3 * Hp), wconst),                      # W_comb
        ],
        out_specs=[
            pl.BlockSpec((Tc, Bt, Hp), lambda b, c: (c, b, 0)),      # outputs
            pl.BlockSpec((Bt, Hp), const2),                          # hT
        ],
        scratch_shapes=[pltpu.VMEM((Bt, Hp), jnp.float32)],
    )

    out_tbh_p, hT_p = pl.pallas_call(
        _skip_gru_kernel,
        out_shape=(
            jax.ShapeDtypeStruct((T, Bp, Hp), inputs.dtype),
            jax.ShapeDtypeStruct((Bp, Hp), inputs.dtype),
        ),
        grid_spec=grid_spec,
        compiler_params=pltpu.CompilerParams(
            dimension_semantics=("parallel", "arbitrary"),
            vmem_limit_bytes=vmem_limit),
    )(gi_all, h0_p, zc, gh_const, wlh_k, w_comb)

    out_tbh = out_tbh_p[:, :B, :H]             # strip padding -> (T, B, H)
    hT = hT_p[:B, :H]
    if time_major_output:
        return out_tbh, hT                     # avoids an extra HBM transpose
    return jnp.transpose(out_tbh, (1, 0, 2)), hT


def init_params(key, input_size, hidden_size, latent_size):
    """Deterministic init mimicking PyTorch default uniform(-1/sqrt(H), 1/sqrt(H))."""
    ks = jax.random.split(key, 6)
    k_gru = 1.0 / jnp.sqrt(hidden_size)
    k_lin = 1.0 / jnp.sqrt(hidden_size + latent_size)
    u = lambda k, shape, bound: jax.random.uniform(
        k, shape, jnp.float32, minval=-bound, maxval=bound)
    return {
        "w_ih": u(ks[0], (3 * hidden_size, input_size), k_gru),
        "w_hh": u(ks[1], (3 * hidden_size, hidden_size), k_gru),
        "b_ih": u(ks[2], (3 * hidden_size,), k_gru),
        "b_hh": u(ks[3], (3 * hidden_size,), k_gru),
        "w_lin": u(ks[4], (hidden_size, hidden_size + latent_size), k_lin),
        "b_lin": u(ks[5], (hidden_size,), k_lin),
    }


def skip_gru_reference(inputs, h0, z, params):
    """Pure-JAX reference matching the PyTorch module exactly."""
    H = h0.shape[-1]
    w_lin, b_lin = params["w_lin"], params["b_lin"]
    w_ih, w_hh = params["w_ih"], params["w_hh"]
    b_ih, b_hh = params["b_ih"], params["b_hh"]

    def step(ht, xt):
        hz = jnp.concatenate([ht, z], axis=-1)
        ht_hat = hz @ w_lin.T + b_lin
        gi = xt @ w_ih.T + b_ih
        gh = ht_hat @ w_hh.T + b_hh
        r = jax.nn.sigmoid(gi[:, :H] + gh[:, :H])
        zg = jax.nn.sigmoid(gi[:, H:2 * H] + gh[:, H:2 * H])
        n = jnp.tanh(gi[:, 2 * H:] + r * gh[:, 2 * H:])
        h_new = (1.0 - zg) * n + zg * ht_hat
        return h_new, h_new

    hT, outs = jax.lax.scan(step, h0, jnp.transpose(inputs, (1, 0, 2)))
    return jnp.transpose(outs, (1, 0, 2)), hT


if __name__ == "__main__":
    B, T, I, H, L = 2, 8, 8, 32, 16

    key = jax.random.PRNGKey(0)
    k_x, k_h, k_z, k_p = jax.random.split(key, 4)
    inputs = jax.random.normal(k_x, (B, T, I), jnp.float32)
    h0 = jax.random.normal(k_h, (B, H), jnp.float32)
    z = jax.random.normal(k_z, (B, L), jnp.float32)
    params = init_params(k_p, I, H, L)

    ref_out, ref_hT = skip_gru_reference(inputs, h0, z, params)

    # f32 weights: tight match against the reference.
    outputs, hT = skip_gru_forward(inputs, h0, z, params)
    jax.block_until_ready((outputs, hT))
    assert outputs.shape == (B, T, H) and hT.shape == (B, H)
    assert jnp.allclose(outputs, ref_out, rtol=1e-3, atol=1e-4)
    assert jnp.allclose(hT, ref_hT, rtol=1e-3, atol=1e-4)

    # bf16 weights for the in-loop MXU matmuls (f32 accumulation / gate math).
    outputs_bf, hT_bf = skip_gru_forward(inputs, h0, z, params,
                                         weight_dtype=jnp.bfloat16)
    jax.block_until_ready((outputs_bf, hT_bf))
    assert jnp.allclose(outputs_bf, ref_out, rtol=5e-2, atol=5e-2)
    assert jnp.allclose(hT_bf, ref_hT, rtol=5e-2, atol=5e-2)

    print("KERNEL_OK")
</pallas_src>

<mosaic_0001>
module attributes {stable_mosaic.version = 11 : i64} {
  func.func @_skip_gru_kernel(%arg0: i32, %arg1: i32, %arg2: memref<8x8x384xf32, #tpu.memory_space<vmem>>, %arg3: memref<8x128xf32, #tpu.memory_space<vmem>>, %arg4: memref<8x128xf32, #tpu.memory_space<vmem>>, %arg5: memref<8x384xf32, #tpu.memory_space<vmem>>, %arg6: memref<128x128xf32, #tpu.memory_space<vmem>>, %arg7: memref<128x384xf32, #tpu.memory_space<vmem>>, %arg8: memref<8x8x128xf32, #tpu.memory_space<vmem>>, %arg9: memref<8x128xf32, #tpu.memory_space<vmem>>, %arg10: memref<8x128xf32, #tpu.memory_space<vmem>>) attributes {dimension_semantics = [#tpu.dimension_semantics<parallel>, #tpu.dimension_semantics<arbitrary>], iteration_bounds = array<i64: 1, 1>, scalar_prefetch = 0 : i64, scratch_operands = 1 : i64, tpu.core_type = #tpu.core_type<tc>, window_params = [{transform_indices = @transform_0, window_bounds = array<i64: 8, 8, 384>}, {transform_indices = @transform_1, window_bounds = array<i64: 8, 128>}, {transform_indices = @transform_2, window_bounds = array<i64: 8, 128>}, {transform_indices = @transform_3, window_bounds = array<i64: 8, 384>}, {pipeline_mode = #tpu.pipeline_mode<synchronous>, transform_indices = @transform_4, window_bounds = array<i64: 128, 128>}, {pipeline_mode = #tpu.pipeline_mode<synchronous>, transform_indices = @transform_5, window_bounds = array<i64: 128, 384>}, {transform_indices = @transform_6, window_bounds = array<i64: 8, 8, 128>}, {transform_indices = @transform_7, window_bounds = array<i64: 8, 128>}]} {
    %c0_i32 = arith.constant 0 : i32
    %0 = arith.cmpi eq, %arg1, %c0_i32 : i32
    %1 = arith.extui %0 : i1 to i32
    %c0_i32_0 = arith.constant 0 : i32
    %2 = arith.cmpi ne, %1, %c0_i32_0 : i32
    scf.if %2 {
      %c0_86 = arith.constant 0 : index
      %c0_87 = arith.constant 0 : index
      %308 = vector.load %arg3[%c0_86, %c0_87] : memref<8x128xf32, #tpu.memory_space<vmem>>, vector<8x128xf32>
      %c0_88 = arith.constant 0 : index
      %c0_89 = arith.constant 0 : index
      %309 = vector.load %arg10[%c0_88, %c0_89] : memref<8x128xf32, #tpu.memory_space<vmem>>, vector<8x128xf32>
      tpu.vector_store %arg10[%c0_88, %c0_89], %308 {strides = array<i32>} : memref<8x128xf32, #tpu.memory_space<vmem>>, vector<8x128xf32>,
    } else {
    }
    %c0 = arith.constant 0 : index
    %c0_1 = arith.constant 0 : index
    %3 = vector.load %arg4[%c0, %c0_1] : memref<8x128xf32, #tpu.memory_space<vmem>>, vector<8x128xf32>
    %c0_2 = arith.constant 0 : index
    %c0_3 = arith.constant 0 : index
    %4 = vector.load %arg5[%c0_2, %c0_3] : memref<8x384xf32, #tpu.memory_space<vmem>>, vector<8x384xf32>
    %c0_4 = arith.constant 0 : index
    %c0_5 = arith.constant 0 : index
    %5 = vector.load %arg6[%c0_4, %c0_5] : memref<128x128xf32, #tpu.memory_space<vmem>>, vector<128x128xf32>
    %c0_6 = arith.constant 0 : index
    %c0_7 = arith.constant 0 : index
    %6 = vector.load %arg7[%c0_6, %c0_7] : memref<128x384xf32, #tpu.memory_space<vmem>>, vector<128x384xf32>
    %c0_8 = arith.constant 0 : index
    %c0_9 = arith.constant 0 : index
    %7 = vector.load %arg10[%c0_8, %c0_9] : memref<8x128xf32, #tpu.memory_space<vmem>>, vector<8x128xf32>
    %c0_i32_10 = arith.constant 0 : i32
    %cst = arith.constant dense<0.000000e+00> : vector<8x128xf32>
    %8 = tpu.matmul %7, %5, %cst {dimension_numbers = #tpu.dot_dimension_numbers<[1], [0], [0], [1], [0, 0, 1, 1], [], []>} : vector<8x128xf32>, vector<128x128xf32>, vector<8x128xf32> -> vector<8x128xf32>
    %9 = arith.addf %8, %3 : vector<8x128xf32>
    %cst_11 = arith.constant dense<0.000000e+00> : vector<8x384xf32>
    %10 = tpu.matmul %7, %6, %cst_11 {dimension_numbers = #tpu.dot_dimension_numbers<[1], [0], [0], [1], [0, 0, 1, 1], [], []>} : vector<8x128xf32>, vector<128x384xf32>, vector<8x384xf32> -> vector<8x384xf32>
    %11 = arith.addf %10, %4 : vector<8x384xf32>
    %12 = arith.index_cast %c0_i32_10 : i32 to index
    %c0_12 = arith.constant 0 : index
    %c0_13 = arith.constant 0 : index
    %13 = vector.load %arg2[%12, %c0_12, %c0_13] : memref<8x8x384xf32, #tpu.memory_space<vmem>>, vector<1x8x384xf32>
    %14 = vector.shape_cast %13 : vector<1x8x384xf32> to vector<8x384xf32>
    %15 = vector.extract_strided_slice %14 {offsets = [0, 0], sizes = [8, 128], strides = [1, 1]} : vector<8x384xf32> to vector<8x128xf32>
    %16 = vector.extract_strided_slice %11 {offsets = [0, 0], sizes = [8, 128], strides = [1, 1]} : vector<8x384xf32> to vector<8x128xf32>
    %17 = arith.addf %15, %16 : vector<8x128xf32>
    %18 = arith.negf %17 : vector<8x128xf32>
    %19 = math.exp %18 : vector<8x128xf32>
    %cst_14 = arith.constant 1.000000e+00 : f32
    %20 = vector.broadcast %cst_14 : f32 to vector<8x128xf32>
    %21 = arith.addf %20, %19 : vector<8x128xf32>
    %22 = arith.divf %20, %21 : vector<8x128xf32>
    %23 = vector.extract_strided_slice %14 {offsets = [0, 128], sizes = [8, 128], strides = [1, 1]} : vector<8x384xf32> to vector<8x128xf32>
    %24 = vector.extract_strided_slice %11 {offsets = [0, 128], sizes = [8, 128], strides = [1, 1]} : vector<8x384xf32> to vector<8x128xf32>
    %25 = arith.addf %23, %24 : vector<8x128xf32>
    %26 = arith.negf %25 : vector<8x128xf32>
    %27 = math.exp %26 : vector<8x128xf32>
    %cst_15 = arith.constant 1.000000e+00 : f32
    %28 = vector.broadcast %cst_15 : f32 to vector<8x128xf32>
    %29 = arith.addf %28, %27 : vector<8x128xf32>
    %30 = arith.divf %28, %29 : vector<8x128xf32>
    %31 = vector.extract_strided_slice %14 {offsets = [0, 256], sizes = [8, 128], strides = [1, 1]} : vector<8x384xf32> to vector<8x128xf32>
    %32 = vector.extract_strided_slice %11 {offsets = [0, 256], sizes = [8, 128], strides = [1, 1]} : vector<8x384xf32> to vector<8x128xf32>
    %33 = arith.mulf %22, %32 : vector<8x128xf32>
    %34 = arith.addf %31, %33 : vector<8x128xf32>
    %35 = math.tanh %34 : vector<8x128xf32>
    %cst_16 = arith.constant 1.000000e+00 : f32
    %36 = vector.broadcast %cst_16 : f32 to vector<8x128xf32>
    %37 = arith.subf %36, %30 : vector<8x128xf32>
    %38 = arith.mulf %37, %35 : vector<8x128xf32>
    %39 = arith.mulf %30, %9 : vector<8x128xf32>
    %40 = arith.addf %38, %39 : vector<8x128xf32>
    %41 = arith.index_cast %c0_i32_10 : i32 to index
    %c0_17 = arith.constant 0 : index
    %c0_18 = arith.constant 0 : index
    %42 = vector.load %arg8[%41, %c0_17, %c0_18] : memref<8x8x128xf32, #tpu.memory_space<vmem>>, vector<1x8x128xf32>
    %43 = vector.shape_cast %42 : vector<1x8x128xf32> to vector<8x128xf32>
    %44 = vector.shape_cast %40 : vector<8x128xf32> to vector<1x8x128xf32>
    tpu.vector_store %arg8[%41, %c0_17, %c0_18], %44 {strides = array<i32>} : memref<8x8x128xf32, #tpu.memory_space<vmem>>, vector<1x8x128xf32>,
    %c1_i32 = arith.constant 1 : i32
    %cst_19 = arith.constant dense<0.000000e+00> : vector<8x128xf32>
    %45 = tpu.matmul %40, %5, %cst_19 {dimension_numbers = #tpu.dot_dimension_numbers<[1], [0], [0], [1], [0, 0, 1, 1], [], []>} : vector<8x128xf32>, vector<128x128xf32>, vector<8x128xf32> -> vector<8x128xf32>
    %46 = arith.addf %45, %3 : vector<8x128xf32>
    %cst_20 = arith.constant dense<0.000000e+00> : vector<8x384xf32>
    %47 = tpu.matmul %40, %6, %cst_20 {dimension_numbers = #tpu.dot_dimension_numbers<[1], [0], [0], [1], [0, 0, 1, 1], [], []>} : vector<8x128xf32>, vector<128x384xf32>, vector<8x384xf32> -> vector<8x384xf32>
    %48 = arith.addf %47, %4 : vector<8x384xf32>
    %49 = arith.index_cast %c1_i32 : i32 to index
    %c0_21 = arith.constant 0 : index
    %c0_22 = arith.constant 0 : index
    %50 = vector.load %arg2[%49, %c0_21, %c0_22] : memref<8x8x384xf32, #tpu.memory_space<vmem>>, vector<1x8x384xf32>
    %51 = vector.shape_cast %50 : vector<1x8x384xf32> to vector<8x384xf32>
    %52 = vector.extract_strided_slice %51 {offsets = [0, 0], sizes = [8, 128], strides = [1, 1]} : vector<8x384xf32> to vector<8x128xf32>
    %53 = vector.extract_strided_slice %48 {offsets = [0, 0], sizes = [8, 128], strides = [1, 1]} : vector<8x384xf32> to vector<8x128xf32>
    %54 = arith.addf %52, %53 : vector<8x128xf32>
    %55 = arith.negf %54 : vector<8x128xf32>
    %56 = math.exp %55 : vector<8x128xf32>
    %cst_23 = arith.constant 1.000000e+00 : f32
    %57 = vector.broadcast %cst_23 : f32 to vector<8x128xf32>
    %58 = arith.addf %57, %56 : vector<8x128xf32>
    %59 = arith.divf %57, %58 : vector<8x128xf32>
    %60 = vector.extract_strided_slice %51 {offsets = [0, 128], sizes = [8, 128], strides = [1, 1]} : vector<8x384xf32> to vector<8x128xf32>
    %61 = vector.extract_strided_slice %48 {offsets = [0, 128], sizes = [8, 128], strides = [1, 1]} : vector<8x384xf32> to vector<8x128xf32>
    %62 = arith.addf %60, %61 : vector<8x128xf32>
    %63 = arith.negf %62 : vector<8x128xf32>
    %64 = math.exp %63 : vector<8x128xf32>
    %cst_24 = arith.constant 1.000000e+00 : f32
    %65 = vector.broadcast %cst_24 : f32 to vector<8x128xf32>
    %66 = arith.addf %65, %64 : vector<8x128xf32>
    %67 = arith.divf %65, %66 : vector<8x128xf32>
    %68 = vector.extract_strided_slice %51 {offsets = [0, 256], sizes = [8, 128], strides = [1, 1]} : vector<8x384xf32> to vector<8x128xf32>
    %69 = vector.extract_strided_slice %48 {offsets = [0, 256], sizes = [8, 128], strides = [1, 1]} : vector<8x384xf32> to vector<8x128xf32>
    %70 = arith.mulf %59, %69 : vector<8x128xf32>
    %71 = arith.addf %68, %70 : vector<8x128xf32>
    %72 = math.tanh %71 : vector<8x128xf32>
    %cst_25 = arith.constant 1.000000e+00 : f32
    %73 = vector.broadcast %cst_25 : f32 to vector<8x128xf32>
    %74 = arith.subf %73, %67 : vector<8x128xf32>
    %75 = arith.mulf %74, %72 : vector<8x128xf32>
    %76 = arith.mulf %67, %46 : vector<8x128xf32>
    %77 = arith.addf %75, %76 : vector<8x128xf32>
    %78 = arith.index_cast %c1_i32 : i32 to index
    %c0_26 = arith.constant 0 : index
    %c0_27 = arith.constant 0 : index
    %79 = vector.load %arg8[%78, %c0_26, %c0_27] : memref<8x8x128xf32, #tpu.memory_space<vmem>>, vector<1x8x128xf32>
    %80 = vector.shape_cast %79 : vector<1x8x128xf32> to vector<8x128xf32>
    %81 = vector.shape_cast %77 : vector<8x128xf32> to vector<1x8x128xf32>
    tpu.vector_store %arg8[%78, %c0_26, %c0_27], %81 {strides = array<i32>} : memref<8x8x128xf32, #tpu.memory_space<vmem>>, vector<1x8x128xf32>,
    %c2_i32 = arith.constant 2 : i32
    %cst_28 = arith.constant dense<0.000000e+00> : vector<8x128xf32>
    %82 = tpu.matmul %77, %5, %cst_28 {dimension_numbers = #tpu.dot_dimension_numbers<[1], [0], [0], [1], [0, 0, 1, 1], [], []>} : vector<8x128xf32>, vector<128x128xf32>, vector<8x128xf32> -> vector<8x128xf32>
    %83 = arith.addf %82, %3 : vector<8x128xf32>
    %cst_29 = arith.constant dense<0.000000e+00> : vector<8x384xf32>
    %84 = tpu.matmul %77, %6, %cst_29 {dimension_numbers = #tpu.dot_dimension_numbers<[1], [0], [0], [1], [0, 0, 1, 1], [], []>} : vector<8x128xf32>, vector<128x384xf32>, vector<8x384xf32> -> vector<8x384xf32>
    %85 = arith.addf %84, %4 : vector<8x384xf32>
    %86 = arith.index_cast %c2_i32 : i32 to index
    %c0_30 = arith.constant 0 : index
    %c0_31 = arith.constant 0 : index
    %87 = vector.load %arg2[%86, %c0_30, %c0_31] : memref<8x8x384xf32, #tpu.memory_space<vmem>>, vector<1x8x384xf32>
    %88 = vector.shape_cast %87 : vector<1x8x384xf32> to vector<8x384xf32>
    %89 = vector.extract_strided_slice %88 {offsets = [0, 0], sizes = [8, 128], strides = [1, 1]} : vector<8x384xf32> to vector<8x128xf32>
    %90 = vector.extract_strided_slice %85 {offsets = [0, 0], sizes = [8, 128], strides = [1, 1]} : vector<8x384xf32> to vector<8x128xf32>
    %91 = arith.addf %89, %90 : vector<8x128xf32>
    %92 = arith.negf %91 : vector<8x128xf32>
    %93 = math.exp %92 : vector<8x128xf32>
    %cst_32 = arith.constant 1.000000e+00 : f32
    %94 = vector.broadcast %cst_32 : f32 to vector<8x128xf32>
    %95 = arith.addf %94, %93 : vector<8x128xf32>
    %96 = arith.divf %94, %95 : vector<8x128xf32>
    %97 = vector.extract_strided_slice %88 {offsets = [0, 128], sizes = [8, 128], strides = [1, 1]} : vector<8x384xf32> to vector<8x128xf32>
    %98 = vector.extract_strided_slice %85 {offsets = [0, 128], sizes = [8, 128], strides = [1, 1]} : vector<8x384xf32> to vector<8x128xf32>
    %99 = arith.addf %97, %98 : vector<8x128xf32>
    %100 = arith.negf %99 : vector<8x128xf32>
    %101 = math.exp %100 : vector<8x128xf32>
    %cst_33 = arith.constant 1.000000e+00 : f32
    %102 = vector.broadcast %cst_33 : f32 to vector<8x128xf32>
    %103 = arith.addf %102, %101 : vector<8x128xf32>
    %104 = arith.divf %102, %103 : vector<8x128xf32>
    %105 = vector.extract_strided_slice %88 {offsets = [0, 256], sizes = [8, 128], strides = [1, 1]} : vector<8x384xf32> to vector<8x128xf32>
    %106 = vector.extract_strided_slice %85 {offsets = [0, 256], sizes = [8, 128], strides = [1, 1]} : vector<8x384xf32> to vector<8x128xf32>
    %107 = arith.mulf %96, %106 : vector<8x128xf32>
    %108 = arith.addf %105, %107 : vector<8x128xf32>
    %109 = math.tanh %108 : vector<8x128xf32>
    %cst_34 = arith.constant 1.000000e+00 : f32
    %110 = vector.broadcast %cst_34 : f32 to vector<8x128xf32>
    %111 = arith.subf %110, %104 : vector<8x128xf32>
    %112 = arith.mulf %111, %109 : vector<8x128xf32>
    %113 = arith.mulf %104, %83 : vector<8x128xf32>
    %114 = arith.addf %112, %113 : vector<8x128xf32>
    %115 = arith.index_cast %c2_i32 : i32 to index
    %c0_35 = arith.constant 0 : index
    %c0_36 = arith.constant 0 : index
    %116 = vector.load %arg8[%115, %c0_35, %c0_36] : memref<8x8x128xf32, #tpu.memory_space<vmem>>, vector<1x8x128xf32>
    %117 = vector.shape_cast %116 : vector<1x8x128xf32> to vector<8x128xf32>
    %118 = vector.shape_cast %114 : vector<8x128xf32> to vector<1x8x128xf32>
    tpu.vector_store %arg8[%115, %c0_35, %c0_36], %118 {strides = array<i32>} : memref<8x8x128xf32, #tpu.memory_space<vmem>>, vector<1x8x128xf32>,
    %c3_i32 = arith.constant 3 : i32
    %cst_37 = arith.constant dense<0.000000e+00> : vector<8x128xf32>
    %119 = tpu.matmul %114, %5, %cst_37 {dimension_numbers = #tpu.dot_dimension_numbers<[1], [0], [0], [1], [0, 0, 1, 1], [], []>} : vector<8x128xf32>, vector<128x128xf32>, vector<8x128xf32> -> vector<8x128xf32>
    %120 = arith.addf %119, %3 : vector<8x128xf32>
    %cst_38 = arith.constant dense<0.000000e+00> : vector<8x384xf32>
    %121 = tpu.matmul %114, %6, %cst_38 {dimension_numbers = #tpu.dot_dimension_numbers<[1], [0], [0], [1], [0, 0, 1, 1], [], []>} : vector<8x128xf32>, vector<128x384xf32>, vector<8x384xf32> -> vector<8x384xf32>
    %122 = arith.addf %121, %4 : vector<8x384xf32>
    %123 = arith.index_cast %c3_i32 : i32 to index
    %c0_39 = arith.constant 0 : index
    %c0_40 = arith.constant 0 : index
    %124 = vector.load %arg2[%123, %c0_39, %c0_40] : memref<8x8x384xf32, #tpu.memory_space<vmem>>, vector<1x8x384xf32>
    %125 = vector.shape_cast %124 : vector<1x8x384xf32> to vector<8x384xf32>
    %126 = vector.extract_strided_slice %125 {offsets = [0, 0], sizes = [8, 128], strides = [1, 1]} : vector<8x384xf32> to vector<8x128xf32>
    %127 = vector.extract_strided_slice %122 {offsets = [0, 0], sizes = [8, 128], strides = [1, 1]} : vector<8x384xf32> to vector<8x128xf32>
    %128 = arith.addf %126, %127 : vector<8x128xf32>
    %129 = arith.negf %128 : vector<8x128xf32>
    %130 = math.exp %129 : vector<8x128xf32>
    %cst_41 = arith.constant 1.000000e+00 : f32
    %131 = vector.broadcast %cst_41 : f32 to vector<8x128xf32>
    %132 = arith.addf %131, %130 : vector<8x128xf32>
    %133 = arith.divf %131, %132 : vector<8x128xf32>
    %134 = vector.extract_strided_slice %125 {offsets = [0, 128], sizes = [8, 128], strides = [1, 1]} : vector<8x384xf32> to vector<8x128xf32>
    %135 = vector.extract_strided_slice %122 {offsets = [0, 128], sizes = [8, 128], strides = [1, 1]} : vector<8x384xf32> to vector<8x128xf32>
    %136 = arith.addf %134, %135 : vector<8x128xf32>
    %137 = arith.negf %136 : vector<8x128xf32>
    %138 = math.exp %137 : vector<8x128xf32>
    %cst_42 = arith.constant 1.000000e+00 : f32
    %139 = vector.broadcast %cst_42 : f32 to vector<8x128xf32>
    %140 = arith.addf %139, %138 : vector<8x128xf32>
    %141 = arith.divf %139, %140 : vector<8x128xf32>
    %142 = vector.extract_strided_slice %125 {offsets = [0, 256], sizes = [8, 128], strides = [1, 1]} : vector<8x384xf32> to vector<8x128xf32>
    %143 = vector.extract_strided_slice %122 {offsets = [0, 256], sizes = [8, 128], strides = [1, 1]} : vector<8x384xf32> to vector<8x128xf32>
    %144 = arith.mulf %133, %143 : vector<8x128xf32>
    %145 = arith.addf %142, %144 : vector<8x128xf32>
    %146 = math.tanh %145 : vector<8x128xf32>
    %cst_43 = arith.constant 1.000000e+00 : f32
    %147 = vector.broadcast %cst_43 : f32 to vector<8x128xf32>
    %148 = arith.subf %147, %141 : vector<8x128xf32>
    %149 = arith.mulf %148, %146 : vector<8x128xf32>
    %150 = arith.mulf %141, %120 : vector<8x128xf32>
    %151 = arith.addf %149, %150 : vector<8x128xf32>
    %152 = arith.index_cast %c3_i32 : i32 to index
    %c0_44 = arith.constant 0 : index
    %c0_45 = arith.constant 0 : index
    %153 = vector.load %arg8[%152, %c0_44, %c0_45] : memref<8x8x128xf32, #tpu.memory_space<vmem>>, vector<1x8x128xf32>
    %154 = vector.shape_cast %153 : vector<1x8x128xf32> to vector<8x128xf32>
    %155 = vector.shape_cast %151 : vector<8x128xf32> to vector<1x8x128xf32>
    tpu.vector_store %arg8[%152, %c0_44, %c0_45], %155 {strides = array<i32>} : memref<8x8x128xf32, #tpu.memory_space<vmem>>, vector<1x8x128xf32>,
    %c4_i32 = arith.constant 4 : i32
    %cst_46 = arith.constant dense<0.000000e+00> : vector<8x128xf32>
    %156 = tpu.matmul %151, %5, %cst_46 {dimension_numbers = #tpu.dot_dimension_numbers<[1], [0], [0], [1], [0, 0, 1, 1], [], []>} : vector<8x128xf32>, vector<128x128xf32>, vector<8x128xf32> -> vector<8x128xf32>
    %157 = arith.addf %156, %3 : vector<8x128xf32>
    %cst_47 = arith.constant dense<0.000000e+00> : vector<8x384xf32>
    %158 = tpu.matmul %151, %6, %cst_47 {dimension_numbers = #tpu.dot_dimension_numbers<[1], [0], [0], [1], [0, 0, 1, 1], [], []>} : vector<8x128xf32>, vector<128x384xf32>, vector<8x384xf32> -> vector<8x384xf32>
    %159 = arith.addf %158, %4 : vector<8x384xf32>
    %160 = arith.index_cast %c4_i32 : i32 to index
    %c0_48 = arith.constant 0 : index
    %c0_49 = arith.constant 0 : index
    %161 = vector.load %arg2[%160, %c0_48, %c0_49] : memref<8x8x384xf32, #tpu.memory_space<vmem>>, vector<1x8x384xf32>
    %162 = vector.shape_cast %161 : vector<1x8x384xf32> to vector<8x384xf32>
    %163 = vector.extract_strided_slice %162 {offsets = [0, 0], sizes = [8, 128], strides = [1, 1]} : vector<8x384xf32> to vector<8x128xf32>
    %164 = vector.extract_strided_slice %159 {offsets = [0, 0], sizes = [8, 128], strides = [1, 1]} : vector<8x384xf32> to vector<8x128xf32>
    %165 = arith.addf %163, %164 : vector<8x128xf32>
    %166 = arith.negf %165 : vector<8x128xf32>
    %167 = math.exp %166 : vector<8x128xf32>
    %cst_50 = arith.constant 1.000000e+00 : f32
    %168 = vector.broadcast %cst_50 : f32 to vector<8x128xf32>
    %169 = arith.addf %168, %167 : vector<8x128xf32>
    %170 = arith.divf %168, %169 : vector<8x128xf32>
    %171 = vector.extract_strided_slice %162 {offsets = [0, 128], sizes = [8, 128], strides = [1, 1]} : vector<8x384xf32> to vector<8x128xf32>
    %172 = vector.extract_strided_slice %159 {offsets = [0, 128], sizes = [8, 128], strides = [1, 1]} : vector<8x384xf32> to vector<8x128xf32>
    %173 = arith.addf %171, %172 : vector<8x128xf32>
    %174 = arith.negf %173 : vector<8x128xf32>
    %175 = math.exp %174 : vector<8x128xf32>
    %cst_51 = arith.constant 1.000000e+00 : f32
    %176 = vector.broadcast %cst_51 : f32 to vector<8x128xf32>
    %177 = arith.addf %176, %175 : vector<8x128xf32>
    %178 = arith.divf %176, %177 : vector<8x128xf32>
    %179 = vector.extract_strided_slice %162 {offsets = [0, 256], sizes = [8, 128], strides = [1, 1]} : vector<8x384xf32> to vector<8x128xf32>
    %180 = vector.extract_strided_slice %159 {offsets = [0, 256], sizes = [8, 128], strides = [1, 1]} : vector<8x384xf32> to vector<8x128xf32>
    %181 = arith.mulf %170, %180 : vector<8x128xf32>
    %182 = arith.addf %179, %181 : vector<8x128xf32>
    %183 = math.tanh %182 : vector<8x128xf32>
    %cst_52 = arith.constant 1.000000e+00 : f32
    %184 = vector.broadcast %cst_52 : f32 to vector<8x128xf32>
    %185 = arith.subf %184, %178 : vector<8x128xf32>
    %186 = arith.mulf %185, %183 : vector<8x128xf32>
    %187 = arith.mulf %178, %157 : vector<8x128xf32>
    %188 = arith.addf %186, %187 : vector<8x128xf32>
    %189 = arith.index_cast %c4_i32 : i32 to index
    %c0_53 = arith.constant 0 : index
    %c0_54 = arith.constant 0 : index
    %190 = vector.load %arg8[%189, %c0_53, %c0_54] : memref<8x8x128xf32, #tpu.memory_space<vmem>>, vector<1x8x128xf32>
    %191 = vector.shape_cast %190 : vector<1x8x128xf32> to vector<8x128xf32>
    %192 = vector.shape_cast %188 : vector<8x128xf32> to vector<1x8x128xf32>
    tpu.vector_store %arg8[%189, %c0_53, %c0_54], %192 {strides = array<i32>} : memref<8x8x128xf32, #tpu.memory_space<vmem>>, vector<1x8x128xf32>,
    %c5_i32 = arith.constant 5 : i32
    %cst_55 = arith.constant dense<0.000000e+00> : vector<8x128xf32>
    %193 = tpu.matmul %188, %5, %cst_55 {dimension_numbers = #tpu.dot_dimension_numbers<[1], [0], [0], [1], [0, 0, 1, 1], [], []>} : vector<8x128xf32>, vector<128x128xf32>, vector<8x128xf32> -> vector<8x128xf32>
    %194 = arith.addf %193, %3 : vector<8x128xf32>
    %cst_56 = arith.constant dense<0.000000e+00> : vector<8x384xf32>
    %195 = tpu.matmul %188, %6, %cst_56 {dimension_numbers = #tpu.dot_dimension_numbers<[1], [0], [0], [1], [0, 0, 1, 1], [], []>} : vector<8x128xf32>, vector<128x384xf32>, vector<8x384xf32> -> vector<8x384xf32>
    %196 = arith.addf %195, %4 : vector<8x384xf32>
    %197 = arith.index_cast %c5_i32 : i32 to index
    %c0_57 = arith.constant 0 : index
    %c0_58 = arith.constant 0 : index
    %198 = vector.load %arg2[%197, %c0_57, %c0_58] : memref<8x8x384xf32, #tpu.memory_space<vmem>>, vector<1x8x384xf32>
    %199 = vector.shape_cast %198 : vector<1x8x384xf32> to vector<8x384xf32>
    %200 = vector.extract_strided_slice %199 {offsets = [0, 0], sizes = [8, 128], strides = [1, 1]} : vector<8x384xf32> to vector<8x128xf32>
    %201 = vector.extract_strided_slice %196 {offsets = [0, 0], sizes = [8, 128], strides = [1, 1]} : vector<8x384xf32> to vector<8x128xf32>
    %202 = arith.addf %200, %201 : vector<8x128xf32>
    %203 = arith.negf %202 : vector<8x128xf32>
    %204 = math.exp %203 : vector<8x128xf32>
    %cst_59 = arith.constant 1.000000e+00 : f32
    %205 = vector.broadcast %cst_59 : f32 to vector<8x128xf32>
    %206 = arith.addf %205, %204 : vector<8x128xf32>
    %207 = arith.divf %205, %206 : vector<8x128xf32>
    %208 = vector.extract_strided_slice %199 {offsets = [0, 128], sizes = [8, 128], strides = [1, 1]} : vector<8x384xf32> to vector<8x128xf32>
    %209 = vector.extract_strided_slice %196 {offsets = [0, 128], sizes = [8, 128], strides = [1, 1]} : vector<8x384xf32> to vector<8x128xf32>
    %210 = arith.addf %208, %209 : vector<8x128xf32>
    %211 = arith.negf %210 : vector<8x128xf32>
    %212 = math.exp %211 : vector<8x128xf32>
    %cst_60 = arith.constant 1.000000e+00 : f32
    %213 = vector.broadcast %cst_60 : f32 to vector<8x128xf32>
    %214 = arith.addf %213, %212 : vector<8x128xf32>
    %215 = arith.divf %213, %214 : vector<8x128xf32>
    %216 = vector.extract_strided_slice %199 {offsets = [0, 256], sizes = [8, 128], strides = [1, 1]} : vector<8x384xf32> to vector<8x128xf32>
    %217 = vector.extract_strided_slice %196 {offsets = [0, 256], sizes = [8, 128], strides = [1, 1]} : vector<8x384xf32> to vector<8x128xf32>
    %218 = arith.mulf %207, %217 : vector<8x128xf32>
    %219 = arith.addf %216, %218 : vector<8x128xf32>
    %220 = math.tanh %219 : vector<8x128xf32>
    %cst_61 = arith.constant 1.000000e+00 : f32
    %221 = vector.broadcast %cst_61 : f32 to vector<8x128xf32>
    %222 = arith.subf %221, %215 : vector<8x128xf32>
    %223 = arith.mulf %222, %220 : vector<8x128xf32>
    %224 = arith.mulf %215, %194 : vector<8x128xf32>
    %225 = arith.addf %223, %224 : vector<8x128xf32>
    %226 = arith.index_cast %c5_i32 : i32 to index
    %c0_62 = arith.constant 0 : index
    %c0_63 = arith.constant 0 : index
    %227 = vector.load %arg8[%226, %c0_62, %c0_63] : memref<8x8x128xf32, #tpu.memory_space<vmem>>, vector<1x8x128xf32>
    %228 = vector.shape_cast %227 : vector<1x8x128xf32> to vector<8x128xf32>
    %229 = vector.shape_cast %225 : vector<8x128xf32> to vector<1x8x128xf32>
    tpu.vector_store %arg8[%226, %c0_62, %c0_63], %229 {strides = array<i32>} : memref<8x8x128xf32, #tpu.memory_space<vmem>>, vector<1x8x128xf32>,
    %c6_i32 = arith.constant 6 : i32
    %cst_64 = arith.constant dense<0.000000e+00> : vector<8x128xf32>
    %230 = tpu.matmul %225, %5, %cst_64 {dimension_numbers = #tpu.dot_dimension_numbers<[1], [0], [0], [1], [0, 0, 1, 1], [], []>} : vector<8x128xf32>, vector<128x128xf32>, vector<8x128xf32> -> vector<8x128xf32>
    %231 = arith.addf %230, %3 : vector<8x128xf32>
    %cst_65 = arith.constant dense<0.000000e+00> : vector<8x384xf32>
    %232 = tpu.matmul %225, %6, %cst_65 {dimension_numbers = #tpu.dot_dimension_numbers<[1], [0], [0], [1], [0, 0, 1, 1], [], []>} : vector<8x128xf32>, vector<128x384xf32>, vector<8x384xf32> -> vector<8x384xf32>
    %233 = arith.addf %232, %4 : vector<8x384xf32>
    %234 = arith.index_cast %c6_i32 : i32 to index
    %c0_66 = arith.constant 0 : index
    %c0_67 = arith.constant 0 : index
    %235 = vector.load %arg2[%234, %c0_66, %c0_67] : memref<8x8x384xf32, #tpu.memory_space<vmem>>, vector<1x8x384xf32>
    %236 = vector.shape_cast %235 : vector<1x8x384xf32> to vector<8x384xf32>
    %237 = vector.extract_strided_slice %236 {offsets = [0, 0], sizes = [8, 128], strides = [1, 1]} : vector<8x384xf32> to vector<8x128xf32>
    %238 = vector.extract_strided_slice %233 {offsets = [0, 0], sizes = [8, 128], strides = [1, 1]} : vector<8x384xf32> to vector<8x128xf32>
    %239 = arith.addf %237, %238 : vector<8x128xf32>
    %240 = arith.negf %239 : vector<8x128xf32>
    %241 = math.exp %240 : vector<8x128xf32>
    %cst_68 = arith.constant 1.000000e+00 : f32
    %242 = vector.broadcast %cst_68 : f32 to vector<8x128xf32>
    %243 = arith.addf %242, %241 : vector<8x128xf32>
    %244 = arith.divf %242, %243 : vector<8x128xf32>
    %245 = vector.extract_strided_slice %236 {offsets = [0, 128], sizes = [8, 128], strides = [1, 1]} : vector<8x384xf32> to vector<8x128xf32>
    %246 = vector.extract_strided_slice %233 {offsets = [0, 128], sizes = [8, 128], strides = [1, 1]} : vector<8x384xf32> to vector<8x128xf32>
    %247 = arith.addf %245, %246 : vector<8x128xf32>
    %248 = arith.negf %247 : vector<8x128xf32>
    %249 = math.exp %248 : vector<8x128xf32>
    %cst_69 = arith.constant 1.000000e+00 : f32
    %250 = vector.broadcast %cst_69 : f32 to vector<8x128xf32>
    %251 = arith.addf %250, %249 : vector<8x128xf32>
    %252 = arith.divf %250, %251 : vector<8x128xf32>
    %253 = vector.extract_strided_slice %236 {offsets = [0, 256], sizes = [8, 128], strides = [1, 1]} : vector<8x384xf32> to vector<8x128xf32>
    %254 = vector.extract_strided_slice %233 {offsets = [0, 256], sizes = [8, 128], strides = [1, 1]} : vector<8x384xf32> to vector<8x128xf32>
    %255 = arith.mulf %244, %254 : vector<8x128xf32>
    %256 = arith.addf %253, %255 : vector<8x128xf32>
    %257 = math.tanh %256 : vector<8x128xf32>
    %cst_70 = arith.constant 1.000000e+00 : f32
    %258 = vector.broadcast %cst_70 : f32 to vector<8x128xf32>
    %259 = arith.subf %258, %252 : vector<8x128xf32>
    %260 = arith.mulf %259, %257 : vector<8x128xf32>
    %261 = arith.mulf %252, %231 : vector<8x128xf32>
    %262 = arith.addf %260, %261 : vector<8x128xf32>
    %263 = arith.index_cast %c6_i32 : i32 to index
    %c0_71 = arith.constant 0 : index
    %c0_72 = arith.constant 0 : index
    %264 = vector.load %arg8[%263, %c0_71, %c0_72] : memref<8x8x128xf32, #tpu.memory_space<vmem>>, vector<1x8x128xf32>
    %265 = vector.shape_cast %264 : vector<1x8x128xf32> to vector<8x128xf32>
    %266 = vector.shape_cast %262 : vector<8x128xf32> to vector<1x8x128xf32>
    tpu.vector_store %arg8[%263, %c0_71, %c0_72], %266 {strides = array<i32>} : memref<8x8x128xf32, #tpu.memory_space<vmem>>, vector<1x8x128xf32>,
    %c7_i32 = arith.constant 7 : i32
    %cst_73 = arith.constant dense<0.000000e+00> : vector<8x128xf32>
    %267 = tpu.matmul %262, %5, %cst_73 {dimension_numbers = #tpu.dot_dimension_numbers<[1], [0], [0], [1], [0, 0, 1, 1], [], []>} : vector<8x128xf32>, vector<128x128xf32>, vector<8x128xf32> -> vector<8x128xf32>
    %268 = arith.addf %267, %3 : vector<8x128xf32>
    %cst_74 = arith.constant dense<0.000000e+00> : vector<8x384xf32>
    %269 = tpu.matmul %262, %6, %cst_74 {dimension_numbers = #tpu.dot_dimension_numbers<[1], [0], [0], [1], [0, 0, 1, 1], [], []>} : vector<8x128xf32>, vector<128x384xf32>, vector<8x384xf32> -> vector<8x384xf32>
    %270 = arith.addf %269, %4 : vector<8x384xf32>
    %271 = arith.index_cast %c7_i32 : i32 to index
    %c0_75 = arith.constant 0 : index
    %c0_76 = arith.constant 0 : index
    %272 = vector.load %arg2[%271, %c0_75, %c0_76] : memref<8x8x384xf32, #tpu.memory_space<vmem>>, vector<1x8x384xf32>
    %273 = vector.shape_cast %272 : vector<1x8x384xf32> to vector<8x384xf32>
    %274 = vector.extract_strided_slice %273 {offsets = [0, 0], sizes = [8, 128], strides = [1, 1]} : vector<8x384xf32> to vector<8x128xf32>
    %275 = vector.extract_strided_slice %270 {offsets = [0, 0], sizes = [8, 128], strides = [1, 1]} : vector<8x384xf32> to vector<8x128xf32>
    %276 = arith.addf %274, %275 : vector<8x128xf32>
    %277 = arith.negf %276 : vector<8x128xf32>
    %278 = math.exp %277 : vector<8x128xf32>
    %cst_77 = arith.constant 1.000000e+00 : f32
    %279 = vector.broadcast %cst_77 : f32 to vector<8x128xf32>
    %280 = arith.addf %279, %278 : vector<8x128xf32>
    %281 = arith.divf %279, %280 : vector<8x128xf32>
    %282 = vector.extract_strided_slice %273 {offsets = [0, 128], sizes = [8, 128], strides = [1, 1]} : vector<8x384xf32> to vector<8x128xf32>
    %283 = vector.extract_strided_slice %270 {offsets = [0, 128], sizes = [8, 128], strides = [1, 1]} : vector<8x384xf32> to vector<8x128xf32>
    %284 = arith.addf %282, %283 : vector<8x128xf32>
    %285 = arith.negf %284 : vector<8x128xf32>
    %286 = math.exp %285 : vector<8x128xf32>
    %cst_78 = arith.constant 1.000000e+00 : f32
    %287 = vector.broadcast %cst_78 : f32 to vector<8x128xf32>
    %288 = arith.addf %287, %286 : vector<8x128xf32>
    %289 = arith.divf %287, %288 : vector<8x128xf32>
    %290 = vector.extract_strided_slice %273 {offsets = [0, 256], sizes = [8, 128], strides = [1, 1]} : vector<8x384xf32> to vector<8x128xf32>
    %291 = vector.extract_strided_slice %270 {offsets = [0, 256], sizes = [8, 128], strides = [1, 1]} : vector<8x384xf32> to vector<8x128xf32>
    %292 = arith.mulf %281, %291 : vector<8x128xf32>
    %293 = arith.addf %290, %292 : vector<8x128xf32>
    %294 = math.tanh %293 : vector<8x128xf32>
    %cst_79 = arith.constant 1.000000e+00 : f32
    %295 = vector.broadcast %cst_79 : f32 to vector<8x128xf32>
    %296 = arith.subf %295, %289 : vector<8x128xf32>
    %297 = arith.mulf %296, %294 : vector<8x128xf32>
    %298 = arith.mulf %289, %268 : vector<8x128xf32>
    %299 = arith.addf %297, %298 : vector<8x128xf32>
    %300 = arith.index_cast %c7_i32 : i32 to index
    %c0_80 = arith.constant 0 : index
    %c0_81 = arith.constant 0 : index
    %301 = vector.load %arg8[%300, %c0_80, %c0_81] : memref<8x8x128xf32, #tpu.memory_space<vmem>>, vector<1x8x128xf32>
    %302 = vector.shape_cast %301 : vector<1x8x128xf32> to vector<8x128xf32>
    %303 = vector.shape_cast %299 : vector<8x128xf32> to vector<1x8x128xf32>
    tpu.vector_store %arg8[%300, %c0_80, %c0_81], %303 {strides = array<i32>} : memref<8x8x128xf32, #tpu.memory_space<vmem>>, vector<1x8x128xf32>,
    %c8_i32 = arith.constant 8 : i32
    %c0_82 = arith.constant 0 : index
    %c0_83 = arith.constant 0 : index
    %304 = vector.load %arg10[%c0_82, %c0_83] : memref<8x128xf32, #tpu.memory_space<vmem>>, vector<8x128xf32>
    tpu.vector_store %arg10[%c0_82, %c0_83], %299 {strides = array<i32>} : memref<8x128xf32, #tpu.memory_space<vmem>>, vector<8x128xf32>,
    %c0_i32_84 = arith.constant 0 : i32
    %305 = arith.cmpi eq, %arg1, %c0_i32_84 : i32
    %306 = arith.extui %305 : i1 to i32
    %c0_i32_85 = arith.constant 0 : i32
    %307 = arith.cmpi ne, %306, %c0_i32_85 : i32
    scf.if %307 {
      %c0_86 = arith.constant 0 : index
      %c0_87 = arith.constant 0 : index
      %308 = vector.load %arg9[%c0_86, %c0_87] : memref<8x128xf32, #tpu.memory_space<vmem>>, vector<8x128xf32>
      tpu.vector_store %arg9[%c0_86, %c0_87], %299 {strides = array<i32>} : memref<8x128xf32, #tpu.memory_space<vmem>>, vector<8x128xf32>,
    } else {
    }
    return
  }
  func.func @transform_0(%arg0: i32, %arg1: i32) -> (i32, i32, i32) {
    %c0_i32 = arith.constant 0 : i32
    %c0_i32_0 = arith.constant 0 : i32
    return %arg1, %arg0, %c0_i32 : i32, i32, i32
  }
  func.func @transform_1(%arg0: i32, %arg1: i32) -> (i32, i32) {
    %c0_i32 = arith.constant 0 : i32
    %c0_i32_0 = arith.constant 0 : i32
    return %arg0, %c0_i32 : i32, i32
  }
  func.func @transform_2(%arg0: i32, %arg1: i32) -> (i32, i32) {
    %c0_i32 = arith.constant 0 : i32
    %c0_i32_0 = arith.constant 0 : i32
    return %arg0, %c0_i32 : i32, i32
  }
  func.func @transform_3(%arg0: i32, %arg1: i32) -> (i32, i32) {
    %c0_i32 = arith.constant 0 : i32
    %c0_i32_0 = arith.constant 0 : i32
    return %arg0, %c0_i32 : i32, i32
  }
  func.func @transform_4(%arg0: i32, %arg1: i32) -> (i32, i32) {
    %c0_i32 = arith.constant 0 : i32
    %c0_i32_0 = arith.constant 0 : i32
    %c0_i32_1 = arith.constant 0 : i32
    return %c0_i32, %c0_i32_0 : i32, i32
  }
  func.func @transform_5(%arg0: i32, %arg1: i32) -> (i32, i32) {
    %c0_i32 = arith.constant 0 : i32
    %c0_i32_0 = arith.constant 0 : i32
    %c0_i32_1 = arith.constant 0 : i32
    return %c0_i32, %c0_i32_0 : i32, i32
  }
  func.func @transform_6(%arg0: i32, %arg1: i32) -> (i32, i32, i32) {
    %c0_i32 = arith.constant 0 : i32
    %c0_i32_0 = arith.constant 0 : i32
    return %arg1, %arg0, %c0_i32 : i32, i32, i32
  }
  func.func @transform_7(%arg0: i32, %arg1: i32) -> (i32, i32) {
    %c0_i32 = arith.constant 0 : i32
    %c0_i32_0 = arith.constant 0 : i32
    return %arg0, %c0_i32 : i32, i32
  }
}

</mosaic_0001>

<bundles_post_ra>
// kernel: tpu_custom_call.1
= control target key start
LH: loop header
LB: loop body
LE: loop exit
PB: predicated region body
PF: predicated region fallthrough
CT: control target
= control target key end

     0   :  { %13 = vsyncpa [#allocation4], 0  ;;  %s4544_s0 = inlined_call_operand.hbm [shape: f32[8,8,384], index: 0, kind: input, shape index: {}]   ;;  %s4545_s1 = inlined_call_operand.hbm [shape: f32[8,128], index: 1, kind: input, shape index: {}]   ;;  %s4546_s2 = inlined_call_operand.hbm [shape: f32[8,128], index: 2, kind: input, shape index: {}]   ;;  %s4547_s3 = inlined_call_operand.hbm [shape: f32[8,384], index: 3, kind: input, shape index: {}]   ;;  %s4548_s4 = inlined_call_operand.hbm [shape: f32[128,128], index: 4, kind: input, shape index: {}]   ;;  %s4549_s5 = inlined_call_operand.hbm [shape: f32[128,384], index: 5, kind: input, shape index: {}]   ;;  %s4550_s6 = inlined_call_operand.hbm [shape: f32[8,8,128], index: 6, kind: output, shape index: {0}]   ;;  %s4551_s7 = inlined_call_operand.hbm [shape: f32[8,128], index: 7, kind: output, shape index: {1}]  }
   0x1   :  { %14 = vsyncpa [#allocation7], 0 }
   0x2   :  { %15 = vsyncpa [#allocation10], 0 }
   0x3   :  { %16 = vsyncpa [#allocation13], 0 }
   0x4   :  { %17 = vsyncpa [#allocation5], 0 }
   0x5   :  { %18 = vsyncpa [#allocation16], 0  ;;  %s3301_s24 = smov [#allocation6]   ;;  %s3302_s26 = smov [#allocation9]  }
   0x6   :  { %s37_s25 = sshll.u32 %s3301_s24, 4  ;;  %s57_s27 = sshll.u32 %s3302_s26, 4  ;;  %s38_s25 = int_to_ptr.vmem [resolvable:$true] %s37_s25  ;;  %s58_s27 = int_to_ptr.vmem [resolvable:$true] %s57_s27 }
   0x7   :  { %s3137_s28 = scalar_lea.vmem %s38_s25, 128  ;;  %p3142_p1 = scmp.lt.s32.totalorder %s38_s25, %s38_s25 }
   0x8   :  { %p3138_p0 = scmp.ne.s32.totalorder %s38_s25, %s3137_s28  ;;  %p3143_p2 = scmp.lt.s32.totalorder %s3137_s28, %s3137_s28 }
   0xa   :  { %p3144_p3 = por %p3143_p2, %p3142_p1 }
   0xc   :  { %p3145_p4 = pnand %p3144_p3, %p3138_p0 }
   0xe   :  { %3148 = shalt.err (!%p3145_p4)
}
   0xf   :  { %40 = dma.hbm_to_vmem [thread:$0]  %s4545_s1, 128, %s38_s25, [#allocation7]  }
  0x10   :  { %s3157_s8 = scalar_lea.vmem %s58_s27, 384  ;;  %p3162_p6 = scmp.lt.s32.totalorder %s58_s27, %s58_s27 }
  0x11   :  { %p3158_p5 = scmp.ne.s32.totalorder %s58_s27, %s3157_s8  ;;  %p3163_p7 = scmp.lt.s32.totalorder %s3157_s8, %s3157_s8 }
  0x13   :  { %p3164_p8 = por %p3163_p7, %p3162_p6 }
  0x15   :  { %p3165_p9 = pnand %p3164_p8, %p3158_p5 }
  0x17   :  { %3168 = shalt.err (!%p3165_p9)
}
  0x18   :  { %60 = dma.hbm_to_vmem [thread:$0]  %s4547_s3, 384, %s58_s27, [#allocation10]  }
  0x19   :  { %s3303_s11 = smov [#allocation3]  }
  0x1a   :  { %s24_s12 = sshll.u32 %s3303_s11, 4  ;;  %s25_s12 = int_to_ptr.vmem [resolvable:$true] %s24_s12 }
  0x1b   :  { %s3177_s13 = scalar_lea.vmem %s25_s12, 3072  ;;  %p3182_p11 = scmp.lt.s32.totalorder %s25_s12, %s25_s12 }
  0x1c   :  { %p3178_p10 = scmp.ne.s32.totalorder %s25_s12, %s3177_s13  ;;  %p3183_p12 = scmp.lt.s32.totalorder %s3177_s13, %s3177_s13 }
  0x1e   :  { %p3184_p13 = por %p3183_p12, %p3182_p11 }
  0x20   :  { %p3185_p0 = pnand %p3184_p13, %p3178_p10 }
  0x22   :  { %3188 = shalt.err (!%p3185_p0)
}
  0x23   :  { %s3304_s1 = smov 384   ;;  %s3305_s14 = smov 24  }
  0x24   :  { %30 = dma.hbm_to_vmem [thread:$0]  %s4544_s0, 3072, %s25_s12, [#allocation4], %s3304_s1, %s3304_s1, %s3305_s14  }
  0x25   :  { %s3306_s3 = smov [#allocation8]   ;;  %s3307_s18 = smov [#allocation11]  }
  0x26   :  { %s47_s17 = sshll.u32 %s3306_s3, 4  ;;  %s66_s19 = sshll.u32 %s3307_s18, 4  ;;  %s48_s17 = int_to_ptr.vmem [resolvable:$true] %s47_s17  ;;  %s67_s19 = int_to_ptr.vmem [resolvable:$true] %s66_s19 }
  0x27   :  { %s3197_s20 = scalar_lea.vmem %s48_s17, 128  ;;  %p3202_p2 = scmp.lt.s32.totalorder %s48_s17, %s48_s17 }
  0x28   :  { %p3198_p1 = scmp.ne.s32.totalorder %s48_s17, %s3197_s20  ;;  %p3203_p3 = scmp.lt.s32.totalorder %s3197_s20, %s3197_s20 }
  0x2a   :  { %p3204_p4 = por %p3203_p3, %p3202_p2 }
  0x2c   :  { %p3205_p5 = pnand %p3204_p4, %p3198_p1 }
  0x2e   :  { %3208 = shalt.err (!%p3205_p5)
}
  0x2f   :  { %50 = dma.hbm_to_vmem [thread:$0]  %s4546_s2, 128, %s48_s17, [#allocation7]  }
  0x30   :  { %s3217_s23 = scalar_lea.vmem %s67_s19, 2048  ;;  %p3222_p7 = scmp.lt.s32.totalorder %s67_s19, %s67_s19 }
  0x31   :  { %p3218_p6 = scmp.ne.s32.totalorder %s67_s19, %s3217_s23  ;;  %p3223_p8 = scmp.lt.s32.totalorder %s3217_s23, %s3217_s23 }
  0x33   :  { %p3224_p9 = por %p3223_p8, %p3222_p7 }
  0x35   :  { %p3225_p10 = pnand %p3224_p9, %p3218_p6 }
  0x37   :  { %3228 = shalt.err (!%p3225_p10)
}
  0x38   :  { %s3308_s0 = smov 128   ;;  %s3309_s24 = smov 8  }
  0x39   :  { %72 = dma.hbm_to_vmem [thread:$0]  %s4548_s4, 2048, %s67_s19, [#allocation10], %s3308_s0, %s3308_s0, %s3309_s24  }
  0x3a   :  { %s3310_s27 = smov [#allocation12]  }
  0x3b   :  { %s78_s28 = sshll.u32 %s3310_s27, 4  ;;  %s79_s28 = int_to_ptr.vmem [resolvable:$true] %s78_s28 }
  0x3c   :  { %s3237_s2 = scalar_lea.vmem %s79_s28, 6144  ;;  %p3242_p12 = scmp.lt.s32.totalorder %s79_s28, %s79_s28 }
  0x3d   :  { %p3238_p11 = scmp.ne.s32.totalorder %s79_s28, %s3237_s2  ;;  %p3243_p13 = scmp.lt.s32.totalorder %s3237_s2, %s3237_s2 }
  0x3f   :  { %p3244_p0 = por %p3243_p13, %p3242_p12 }
  0x41   :  { %p3245_p1 = pnand %p3244_p0, %p3238_p11 }
  0x43   :  { %3248 = shalt.err (!%p3245_p1)
}
  0x44   :  { %84 = dma.hbm_to_vmem [thread:$0]  %s4549_s5, 6144, %s79_s28, [#allocation13], %s3304_s1, %s3304_s1, %s3305_s14  }
  0x45   :  { %3289 = dma.done.wait [#allocation4], 3072  }
  0x46   :  { %3290 = vsyncadd [#allocation4], 4294964224 }
  0x47   :  { %3291 = dma.done.wait [#allocation7], 256  }
  0x48   :  { %3292 = vsyncadd [#allocation7], 4294967040 }
  0x49   :  { %3293 = dma.done.wait [#allocation10], 2432  }
  0x4a   :  { %3294 = vsyncadd [#allocation10], 4294964864 }
  0x4b   :  { %3295 = dma.done.wait [#allocation13], 6144  }
  0x4c   :  { %3296 = vsyncadd [#allocation13], 4294961152  ;;  %v4582_v0 = vmov 0.0   ;;  %vm3312_vm0 = vmmov 0   ;;  %v3386_v1 = vld [vmem:[#allocation12 + $0x170] sm:$0xff]  ;;  %v3388_v2 = vld [vmem:[#allocation11 + $0x78] sm:$0xff] }
  0x4d   :  { %2407 = vmatprep.subr.mxu0 %v4582_v0  ;;  %312 = vmatprep.mubr.f32.mxu1 %v4582_v0  ;;  %v3390_v3 = vld [vmem:[#allocation12 + $0x168] sm:$0xff]  ;;  %v3394_v4 = vld [vmem:[#allocation12 + $0x158] sm:$0xff]  ;;  %v3396_v5 = vld [vmem:[#allocation11 + $0x70] sm:$0xff]  ;;  %s3313_s4 = smov [#allocation14]   ;;  %s3314_s8 = smov [#allocation15]  }
  0x4e   :  { %2439 = vmatprep.mubr.msk.f32.mxu0 %vm3312_vm0, %v4582_v0  ;;  %248 = vmatprep.subr.mxu1 %v3386_v1  ;;  %v3398_v6 = vld [vmem:[#allocation12 + $0x150] sm:$0xff]  ;;  %v3402_v7 = vld [vmem:[#allocation12 + $0x140] sm:$0xff]  ;;  %v3404_v8 = vld [vmem:[#allocation11 + $0x68] sm:$0xff]  ;;  %s2090_s5 = sshll.u32 %s3313_s4, 4  ;;  %s2103_s9 = sshll.u32 %s3314_s8, 4  ;;  %s2091_s5 = int_to_ptr.vmem [resolvable:$true] %s2090_s5  ;;  %s2104_s9 = int_to_ptr.vmem [resolvable:$true] %s2103_s9 }
  0x4f   :  { %2408 = vmatpush3.msra.mxu0 %v3388_v2  ;;  %249 = vmatpush1.msra.mxu1 %v3390_v3  ;;  %v3408_v9 = vld [vmem:[#allocation12 + $0x138] sm:$0xff]  ;;  %v3412_v10 = vld [vmem:[#allocation12 + $0x128] sm:$0xff]  ;;  %v3414_v11 = vld [vmem:[#allocation11 + $0x60] sm:$0xff]  ;;  %s3249_s10 = scalar_lea.vmem %s2091_s5, 1024  ;;  %p3254_p3 = scmp.lt.s32.totalorder %s2091_s5, %s2091_s5 }
  0x50   :  { %2409 = vmatprep.subr.mxu0 %v4582_v0  ;;  %250 = vmatprep.subr.mxu1 %v3394_v4  ;;  %v3418_v12 = vld [vmem:[#allocation12 + $0x120] sm:$0xff]  ;;  %v3422_v13 = vld [vmem:[#allocation12 + $0x110] sm:$0xff]  ;;  %v3424_v14 = vld [vmem:[#allocation11 + $0x58] sm:$0xff]  ;;  %p3250_p2 = scmp.ne.s32.totalorder %s2091_s5, %s3249_s10  ;;  %p3255_p4 = scmp.lt.s32.totalorder %s3249_s10, %s3249_s10 }
  0x51   :  { %2410 = vmatpush3.msra.mxu0 %v3396_v5  ;;  %251 = vmatpush1.msra.mxu1 %v3398_v6  ;;  %v3428_v15 = vld [vmem:[#allocation12 + $0x108] sm:$0xff]  ;;  %v3432_v16 = vld [vmem:[#allocation12 + $0xf8] sm:$0xff]  ;;  %v3434_v17 = vld [vmem:[#allocation11 + $0x50] sm:$0xff] }
  0x52   :  { %2411 = vmatprep.subr.mxu0 %v4582_v0  ;;  %252 = vmatprep.subr.mxu1 %v3402_v7  ;;  %4649 = vst [vmem:[#allocation23_spill] sm:$0xff] %v3428_v15  ;;  %4650 = vst [vmem:[#allocation24_spill] sm:$0xff] %v3432_v16  ;;  %v3438_v18 = vld [vmem:[#allocation12 + $0xf0] sm:$0xff]  ;;  %v3442_v19 = vld [vmem:[#allocation12 + $0xe0] sm:$0xff]  ;;  %p3256_p5 = por %p3255_p4, %p3254_p3 }
  0x53   :  { %2412 = vmatpush3.msra.mxu0 %v3404_v8  ;;  %253 = vmatpush1.msra.mxu1 %v3408_v9  ;;  %4651 = vst [vmem:[#allocation25_spill] sm:$0xff] %v3438_v18  ;;  %4652 = vst [vmem:[#allocation26_spill] sm:$0xff] %v3442_v19  ;;  %v3444_v20 = vld [vmem:[#allocation11 + $0x48] sm:$0xff]  ;;  %v3448_v21 = vld [vmem:[#allocation12 + $0xd8] sm:$0xff] }
  0x54   :  { %2413 = vmatprep.subr.mxu0 %v4582_v0  ;;  %254 = vmatprep.subr.mxu1 %v3412_v10  ;;  %4653 = vst [vmem:[#allocation27_spill] sm:$0xff] %v3448_v21  ;;  %v3452_v22 = vld [vmem:[#allocation12 + $0xc8] sm:$0xff]  ;;  %v3454_v23 = vld [vmem:[#allocation11 + $0x40] sm:$0xff]  ;;  %v3462_v25 = vld [vmem:[#allocation12 + $0xb0] sm:$0xff]  ;;  %p3257_p6 = pnand %p3256_p5, %p3250_p2 }
  0x55   :  { %2414 = vmatpush3.msra.mxu0 %v3414_v11  ;;  %255 = vmatpush1.msra.mxu1 %v3418_v12  ;;  %4654 = vst [vmem:[#allocation28_spill] sm:$0xff] %v3452_v22  ;;  %v3458_v24 = vld [vmem:[#allocation12 + $0xc0] sm:$0xff]  ;;  %4656 = vst [vmem:[#allocation30_spill] sm:$0xff] %v3462_v25  ;;  %v3464_v26 = vld [vmem:[#allocation11 + $0x38] sm:$0xff] }
  0x56   :  { %2415 = vmatprep.subr.mxu0 %v4582_v0  ;;  %256 = vmatprep.subr.mxu1 %v3422_v13  ;;  %4655 = vst [vmem:[#allocation29_spill] sm:$0xff] %v3458_v24  ;;  %v3468_v27 = vld [vmem:[#allocation12 + $0xa8] sm:$0xff]  ;;  %v3472_v28 = vld [vmem:[#allocation12 + $0x98] sm:$0xff]  ;;  %v3474_v29 = vld [vmem:[#allocation11 + $0x30] sm:$0xff] }
  0x57   :  { %2416 = vmatpush3.msra.mxu0 %v3424_v14  ;;  %257 = vmatpush1.msra.mxu1 %v3428_v15  ;;  %4657 = vst [vmem:[#allocation31_spill] sm:$0xff] %v3468_v27  ;;  %4658 = vst [vmem:[#allocation32_spill] sm:$0xff] %v3472_v28  ;;  %v3478_v30 = vld [vmem:[#allocation12 + $0x90] sm:$0xff]  ;;  %v3482_v31 = vld [vmem:[#allocation12 + $0x80] sm:$0xff] }
  0x58   :  { %2417 = vmatprep.subr.mxu0 %v4582_v0  ;;  %258 = vmatprep.subr.mxu1 %v3432_v16  ;;  %4659 = vst [vmem:[#allocation33_spill] sm:$0xff] %v3478_v30  ;;  %4660 = vst [vmem:[#allocation34_spill] sm:$0xff] %v3482_v31  ;;  %v3484_v32 = vld [vmem:[#allocation11 + $0x28] sm:$0xff]  ;;  %v3488_v33 = vld [vmem:[#allocation12 + $0x78] sm:$0xff] }
  0x59   :  { %2418 = vmatpush3.msra.mxu0 %v3434_v17  ;;  %259 = vmatpush1.msra.mxu1 %v3438_v18  ;;  %4661 = vst [vmem:[#allocation35_spill] sm:$0xff] %v3488_v33  ;;  %v3492_v34 = vld [vmem:[#allocation12 + $0x68] sm:$0xff]  ;;  %v3494_v35 = vld [vmem:[#allocation11 + $0x20] sm:$0xff]  ;;  %v3502_v37 = vld [vmem:[#allocation12 + $0x50] sm:$0xff] }
  0x5a   :  { %2419 = vmatprep.subr.mxu0 %v4582_v0  ;;  %260 = vmatprep.subr.mxu1 %v3442_v19  ;;  %4662 = vst [vmem:[#allocation36_spill] sm:$0xff] %v3492_v34  ;;  %v3498_v36 = vld [vmem:[#allocation12 + $0x60] sm:$0xff]  ;;  %4664 = vst [vmem:[#allocation38_spill] sm:$0xff] %v3502_v37  ;;  %v3504_v38 = vld [vmem:[#allocation11 + $0x18] sm:$0xff] }
  0x5b   :  { %2420 = vmatpush3.msra.mxu0 %v3444_v20  ;;  %261 = vmatpush1.msra.mxu1 %v3448_v21  ;;  %4663 = vst [vmem:[#allocation37_spill] sm:$0xff] %v3498_v36  ;;  %v3508_v39 = vld [vmem:[#allocation12 + $0x48] sm:$0xff]  ;;  %v3512_v40 = vld [vmem:[#allocation12 + $0x38] sm:$0xff]  ;;  %v3514_v41 = vld [vmem:[#allocation11 + $0x10] sm:$0xff] }
  0x5c   :  { %2421 = vmatprep.subr.mxu0 %v4582_v0  ;;  %262 = vmatprep.subr.mxu1 %v3452_v22  ;;  %4665 = vst [vmem:[#allocation39_spill] sm:$0xff] %v3508_v39  ;;  %4666 = vst [vmem:[#allocation40_spill] sm:$0xff] %v3512_v40  ;;  %v3518_v42 = vld [vmem:[#allocation12 + $0x30] sm:$0xff]  ;;  %v3522_v43 = vld [vmem:[#allocation12 + $0x20] sm:$0xff] }
  0x5d   :  { %2422 = vmatpush3.msra.mxu0 %v3454_v23  ;;  %263 = vmatpush1.msra.mxu1 %v3458_v24  ;;  %4667 = vst [vmem:[#allocation41_spill] sm:$0xff] %v3518_v42  ;;  %4668 = vst [vmem:[#allocation42_spill] sm:$0xff] %v3522_v43  ;;  %v3524_v44 = vld [vmem:[#allocation11 + $0x8] sm:$0xff]  ;;  %v3528_v45 = vld [vmem:[#allocation12 + $0x18] sm:$0xff] }
  0x5e   :  { %2423 = vmatprep.subr.mxu0 %v4582_v0  ;;  %264 = vmatprep.subr.mxu1 %v3462_v25  ;;  %4669 = vst [vmem:[#allocation43_spill] sm:$0xff] %v3528_v45  ;;  %v3532_v46 = vld [vmem:[#allocation12 + $0x8] sm:$0xff]  ;;  %v3534_v47 = vld [vmem:[#allocation11] sm:$0xff]  ;;  %v3542_v49 = vld [vmem:[#allocation6] sm:$0xff] }
  0x5f   :  { %2424 = vmatpush3.msra.mxu0 %v3464_v26  ;;  %265 = vmatpush1.msra.mxu1 %v3468_v27  ;;  %4670 = vst [vmem:[#allocation44_spill] sm:$0xff] %v3532_v46  ;;  %v3538_v48 = vld [vmem:[#allocation12] sm:$0xff]  ;;  %v3546_v50 = vld [vmem:[#allocation12 + $0x178] sm:$0xff]  ;;  %v3558_v52 = vld [vmem:[#allocation12 + $0x148] sm:$0xff] }
  0x60   :  { %2425 = vmatprep.subr.mxu0 %v4582_v0  ;;  %266 = vmatprep.subr.mxu1 %v3472_v28  ;;  %4671 = vst [vmem:[#allocation45_spill] sm:$0xff] %v3538_v48  ;;  %v3552_v51 = vld [vmem:[#allocation12 + $0x160] sm:$0xff]  ;;  %v3564_v53 = vld [vmem:[#allocation12 + $0x130] sm:$0xff]  ;;  %v3570_v54 = vld [vmem:[#allocation12 + $0x118] sm:$0xff] }
  0x61   :  { %2426 = vmatpush3.msra.mxu0 %v3474_v29  ;;  %267 = vmatpush1.msra.mxu1 %v3478_v30  ;;  %v3576_v55 = vld [vmem:[#allocation12 + $0x100] sm:$0xff]  ;;  %v3582_v56 = vld [vmem:[#allocation12 + $0xe8] sm:$0xff]  ;;  %v3588_v57 = vld [vmem:[#allocation12 + $0xd0] sm:$0xff] }
  0x62   :  { %2427 = vmatprep.subr.mxu0 %v4582_v0  ;;  %268 = vmatprep.subr.mxu1 %v3482_v31  ;;  %v3594_v58 = vld [vmem:[#allocation12 + $0xb8] sm:$0xff]  ;;  %v3600_v59 = vld [vmem:[#allocation12 + $0xa0] sm:$0xff]  ;;  %v3606_v60 = vld [vmem:[#allocation12 + $0x88] sm:$0xff] }
  0x63   :  { %2428 = vmatpush3.msra.mxu0 %v3484_v32  ;;  %269 = vmatpush1.msra.mxu1 %v3488_v33  ;;  %4672 = vst [vmem:[#allocation46_spill] sm:$0xff] %v3606_v60  ;;  %v3612_v61 = vld [vmem:[#allocation12 + $0x70] sm:$0xff]  ;;  %v3618_v62 = vld [vmem:[#allocation12 + $0x58] sm:$0xff]  ;;  %v3624_v63 = vld [vmem:[#allocation12 + $0x40] sm:$0xff] }
  0x64   :  { %2429 = vmatprep.subr.mxu0 %v4582_v0  ;;  %270 = vmatprep.subr.mxu1 %v3492_v34  ;;  %4673 = vst [vmem:[#allocation47_spill] sm:$0xff] %v3612_v61 }
  0x65   :  { %2430 = vmatpush3.msra.mxu0 %v3494_v35  ;;  %271 = vmatpush1.msra.mxu1 %v3498_v36 }
  0x66   :  { %2431 = vmatprep.subr.mxu0 %v4582_v0  ;;  %272 = vmatprep.subr.mxu1 %v3502_v37 }
  0x67   :  { %2432 = vmatpush3.msra.mxu0 %v3504_v38  ;;  %273 = vmatpush1.msra.mxu1 %v3508_v39 }
  0x68   :  { %2433 = vmatprep.subr.mxu0 %v4582_v0  ;;  %274 = vmatprep.subr.mxu1 %v3512_v40 }
  0x69   :  { %2434 = vmatpush3.msra.mxu0 %v3514_v41  ;;  %275 = vmatpush1.msra.mxu1 %v3518_v42 }
  0x6a   :  { %2435 = vmatprep.subr.mxu0 %v4582_v0  ;;  %276 = vmatprep.subr.mxu1 %v3522_v43 }
  0x6b   :  { %2436 = vmatpush3.msra.mxu0 %v3524_v44  ;;  %277 = vmatpush1.msra.mxu1 %v3528_v45 }
  0x6c   :  { %2437 = vmatprep.subr.mxu0 %v4582_v0  ;;  %278 = vmatprep.subr.mxu1 %v3532_v46 }
  0x6d   :  { %2438 = vmatpush3.msra.mxu0 %v3534_v47  ;;  %279 = vmatpush1.msra.mxu1 %v3538_v48 }
  0x6e   :  { %2442 = vmatprep.subr.mxu0 %v4582_v0  ;;  %313 = vmatmul.mubr.f32.vlgmr.msra.gmra.mxu1 %v3542_v49 }
  0x6f   :  { %2440 = vmatmul.mubr.f32.vlgmr.msra.gmra.mxu0 %v3542_v49  ;;  %2477 = vmatprep.subr.mxu1 %v4582_v0 }
  0x70   :  { %2443 = vmatpush3.msra.mxu0 %v3546_v50  ;;  %2474 = vmatprep.mubr.msk.f32.mxu0 %vm3312_vm0, %v4582_v0 }
  0x71   :  { %2444 = vmatprep.subr.mxu0 %v4582_v0  ;;  %2478 = vmatpush3.msra.mxu1 %v3388_v2 }
  0x72   :  { %2445 = vmatpush3.msra.mxu0 %v3552_v51  ;;  %2479 = vmatprep.subr.mxu1 %v4582_v0 }
  0x73   :  { %2446 = vmatprep.subr.mxu0 %v4582_v0  ;;  %2480 = vmatpush3.msra.mxu1 %v3396_v5 }
  0x74   :  { %2447 = vmatpush3.msra.mxu0 %v3558_v52  ;;  %2481 = vmatprep.subr.mxu1 %v4582_v0 }
  0x75   :  { %2448 = vmatprep.subr.mxu0 %v4582_v0  ;;  %2482 = vmatpush3.msra.mxu1 %v3404_v8 }
  0x76   :  { %2449 = vmatpush3.msra.mxu0 %v3564_v53  ;;  %2483 = vmatprep.subr.mxu1 %v4582_v0 }
  0x77   :  { %2450 = vmatprep.subr.mxu0 %v4582_v0  ;;  %2484 = vmatpush3.msra.mxu1 %v3414_v11 }
  0x78   :  { %2451 = vmatpush3.msra.mxu0 %v3570_v54  ;;  %2485 = vmatprep.subr.mxu1 %v4582_v0 }
  0x79   :  { %2452 = vmatprep.subr.mxu0 %v4582_v0  ;;  %2486 = vmatpush3.msra.mxu1 %v3424_v14 }
  0x7a   :  { %2453 = vmatpush3.msra.mxu0 %v3576_v55  ;;  %2487 = vmatprep.subr.mxu1 %v4582_v0 }
  0x7b   :  { %2454 = vmatprep.subr.mxu0 %v4582_v0  ;;  %2488 = vmatpush3.msra.mxu1 %v3434_v17 }
  0x7c   :  { %2455 = vmatpush3.msra.mxu0 %v3582_v56  ;;  %2489 = vmatprep.subr.mxu1 %v4582_v0 }
  0x7d   :  { %2456 = vmatprep.subr.mxu0 %v4582_v0  ;;  %2490 = vmatpush3.msra.mxu1 %v3444_v20 }
  0x7e   :  { %2457 = vmatpush3.msra.mxu0 %v3588_v57  ;;  %2491 = vmatprep.subr.mxu1 %v4582_v0 }
  0x7f   :  { %2458 = vmatprep.subr.mxu0 %v4582_v0  ;;  %2492 = vmatpush3.msra.mxu1 %v3454_v23 }
  0x80   :  { %2459 = vmatpush3.msra.mxu0 %v3594_v58  ;;  %2493 = vmatprep.subr.mxu1 %v4582_v0 }
  0x81   :  { %2460 = vmatprep.subr.mxu0 %v4582_v0  ;;  %2494 = vmatpush3.msra.mxu1 %v3464_v26 }
  0x82   :  { %2461 = vmatpush3.msra.mxu0 %v3600_v59  ;;  %2495 = vmatprep.subr.mxu1 %v4582_v0 }
  0x83   :  { %2462 = vmatprep.subr.mxu0 %v4582_v0  ;;  %2496 = vmatpush3.msra.mxu1 %v3474_v29 }
  0x84   :  { %2463 = vmatpush3.msra.mxu0 %v3606_v60  ;;  %2497 = vmatprep.subr.mxu1 %v4582_v0  ;;  %v3630_v60 = vld [vmem:[#allocation12 + $0x28] sm:$0xff] }
  0x85   :  { %2464 = vmatprep.subr.mxu0 %v4582_v0  ;;  %2498 = vmatpush3.msra.mxu1 %v3484_v32 }
  0x86   :  { %2465 = vmatpush3.msra.mxu0 %v3612_v61  ;;  %2499 = vmatprep.subr.mxu1 %v4582_v0  ;;  %v3636_v61 = vld [vmem:[#allocation12 + $0x10] sm:$0xff] }
  0x87   :  { %2466 = vmatprep.subr.mxu0 %v4582_v0  ;;  %2500 = vmatpush3.msra.mxu1 %v3494_v35 }
  0x88   :  { %2467 = vmatpush3.msra.mxu0 %v3618_v62  ;;  %2501 = vmatprep.subr.mxu1 %v4582_v0 }
  0x89   :  { %2468 = vmatprep.subr.mxu0 %v4582_v0  ;;  %2502 = vmatpush3.msra.mxu1 %v3504_v38 }
  0x8a   :  { %2469 = vmatpush3.msra.mxu0 %v3624_v63  ;;  %2503 = vmatprep.subr.mxu1 %v4582_v0 }
  0x8b   :  { %2470 = vmatprep.subr.mxu0 %v4582_v0  ;;  %2504 = vmatpush3.msra.mxu1 %v3514_v41 }
  0x8c   :  { %2471 = vmatpush3.msra.mxu0 %v3630_v60  ;;  %2505 = vmatprep.subr.mxu1 %v4582_v0 }
  0x8d   :  { %2472 = vmatprep.subr.mxu0 %v4582_v0  ;;  %2506 = vmatpush3.msra.mxu1 %v3524_v44 }
  0x8e   :  { %2473 = vmatpush3.msra.mxu0 %v3636_v61  ;;  %2507 = vmatprep.subr.mxu1 %v4582_v0 }
  0x8f   :  { %2475 = vmatmul.mubr.f32.vlgmr.msra.gmra.mxu0 %v3542_v49  ;;  %484 = vmatprep.subr.mxu0 %v3386_v1  ;;  %v3685_v49 = vld [vmem:[#allocation9] sm:$0xff] }
  0x90   :  { %485 = vmatpush1.msra.mxu0 %v3390_v3  ;;  %2508 = vmatpush3.msra.mxu1 %v3534_v47  ;;  %4674 = vst [vmem:[#allocation48_spill] sm:$0xff] %v3685_v49 }
  0x91   :  { %486 = vmatprep.subr.mxu0 %v3394_v4  ;;  %2509 = vmatprep.mubr.msk.f32.mxu1 %vm3312_vm0, %v4582_v0 }
  0x92   :  { %487 = vmatpush1.msra.mxu0 %v3398_v6  ;;  %548 = vmatprep.mubr.f32.mxu0 %v4582_v0 }
  0x93   :  { %488 = vmatprep.subr.mxu0 %v3402_v7  ;;  %2512 = vmatprep.subr.mxu1 %v4582_v0 }
  0x94   :  { %489 = vmatpush1.msra.mxu0 %v3408_v9 }
  0x95   :  { %490 = vmatprep.subr.mxu0 %v3412_v10 }
  0x96   :  { %491 = vmatpush1.msra.mxu0 %v3418_v12 }
  0x97   :  { %492 = vmatprep.subr.mxu0 %v3422_v13 }
  0x98   :  { %493 = vmatpush1.msra.mxu0 %v3428_v15 }
  0x99   :  { %494 = vmatprep.subr.mxu0 %v3432_v16 }
  0x9a   :  { %495 = vmatpush1.msra.mxu0 %v3438_v18 }
  0x9b   :  { %496 = vmatprep.subr.mxu0 %v3442_v19 }
  0x9c   :  { %497 = vmatpush1.msra.mxu0 %v3448_v21 }
  0x9d   :  { %498 = vmatprep.subr.mxu0 %v3452_v22 }
  0x9e   :  { %499 = vmatpush1.msra.mxu0 %v3458_v24 }
  0x9f   :  { %500 = vmatprep.subr.mxu0 %v3462_v25  ;;  %v3691_v25 = vld [vmem:[#allocation9 + $0x10] sm:$0xff] }
  0xa0   :  { %501 = vmatpush1.msra.mxu0 %v3468_v27 }
  0xa1   :  { %502 = vmatprep.subr.mxu0 %v3472_v28 }
  0xa2   :  { %503 = vmatpush1.msra.mxu0 %v3478_v30 }
  0xa3   :  { %504 = vmatprep.subr.mxu0 %v3482_v31 }
  0xa4   :  { %505 = vmatpush1.msra.mxu0 %v3488_v33 }
  0xa5   :  { %506 = vmatprep.subr.mxu0 %v3492_v34 }
  0xa6   :  { %507 = vmatpush1.msra.mxu0 %v3498_v36 }
  0xa7   :  { %508 = vmatprep.subr.mxu0 %v3502_v37  ;;  %v389_v37 = vld [vmem:[#allocation3] sm:$0xff] }
  0xa8   :  { %509 = vmatpush1.msra.mxu0 %v3508_v39 }
  0xa9   :  { %510 = vmatprep.subr.mxu0 %v3512_v40  ;;  %v3688_v40 = vld [vmem:[#allocation9 + $0x8] sm:$0xff] }
  0xaa   :  { %511 = vmatpush1.msra.mxu0 %v3518_v42  ;;  %4675 = vst [vmem:[#allocation49_spill] sm:$0xff] %v3688_v40 }
  0xab   :  { %512 = vmatprep.subr.mxu0 %v3522_v43 }
  0xac   :  { %513 = vmatpush1.msra.mxu0 %v3528_v45 }
  0xad   :  { %514 = vmatprep.subr.mxu0 %v3532_v46  ;;  %v390_v46 = vld [vmem:[#allocation3 + $0x8] sm:$0xff] }
  0xae   :  { %515 = vmatpush1.msra.mxu0 %v3538_v48 }
  0xaf   :  { %2547 = vmatprep.subr.mxu0 %v4582_v0 }
 0x12e   :  { %v314_v36 = vpop.f32.mrf.mxu1 }
 0x12f   :  { %v244_v34 = vpop.f32.mrf.mxu0  ;;  %v315_v39 = vadd.f32 %v314_v36, %v3685_v49 }
 0x130   :  { %v316_v42 = vpop.f32.mrf.mxu1 }
 0x131   :  { %v2441_v33 = vpop.f32.mrf.mxu0  ;;  %v392_v43 = vadd.f32 %v389_v37, %v315_v39  ;;  %v317_v45 = vadd.f32 %v316_v42, %v3688_v40  ;;  %v391_v39 = vld [vmem:[#allocation3 + $0x10] sm:$0xff] }
 0x133   :  { %v2119_v31 = vmul.f32 -1.442695, %v392_v43  ;;  %v399_v48 = vadd.f32 %v390_v46, %v317_v45  ;;  %v3694_v45 = vld [vmem:[#allocation8] sm:$0xff] }
 0x135   :  { %2981 = vpow2.f32 %v2119_v31  ;;  %v2120_v30 = vmul.f32 -1.442695, %v399_v48 }
 0x137   :  { %2983 = vpow2.f32 %v2120_v30 }
 0x142   :  { %v2982_v0 = vpop.eup %2981 }
 0x143   :  { %v396_v28 = vadd.f32 1.0, %v2982_v0  ;;  %v245_v0 = vadd.f32 %v244_v34, %v3694_v45  ;;  %v4678_v34 = vld [vmem:[#allocation47_spill] sm:$0xff] }
 0x144   :  { %v2984_v27 = vpop.eup %2983 }
 0x145   :  { %2985 = vrcp.f32 %v396_v28  ;;  %v403_v49 = vadd.f32 1.0, %v2984_v27  ;;  %v4677_v27 = vld [vmem:[#allocation46_spill] sm:$0xff] }
 0x147   :  { %2987 = vrcp.f32 %v403_v49  ;;  %v4680_v49 = vld [vmem:[#allocation30_spill] sm:$0xff] }
 0x14f   :  { %v385_v36 = vpop.f32.mrf.mxu0 }
 0x150   :  { %v386_v24 = vadd.f32 %v385_v36, %v3691_v25  ;;  %v4681_v36 = vld [vmem:[#allocation31_spill] sm:$0xff] }
 0x151   :  { %v2476_v33 = vpop.f32.mrf.mxu0 }
 0x152   :  { %v2986_v37 = vpop.eup %2985  ;;  %v4682_v33 = vld [vmem:[#allocation32_spill] sm:$0xff] }
 0x153   :  { %v406_v42 = vmul.f32 %v2986_v37, %v386_v24  ;;  %v4676_v24 = vmov 0.0   ;;  %v4683_v37 = vld [vmem:[#allocation33_spill] sm:$0xff] }
 0x154   :  { %v2988_v31 = vpop.eup %2987 }
 0x155   :  { %v407_v43 = vadd.f32 %v406_v42, %v391_v39  ;;  %v409_v28 = vsub.f32 1.0, %v2988_v31  ;;  %v411_v48 = vmul.f32 %v2988_v31, %v245_v0  ;;  %v4684_v39 = vld [vmem:[#allocation34_spill] sm:$0xff]  ;;  %v4685_v42 = vld [vmem:[#allocation35_spill] sm:$0xff]  ;;  %v4687_v31 = vld [vmem:[#allocation37_spill] sm:$0xff] }
 0x156   :  { %v4688_v0 = vld [vmem:[#allocation38_spill] sm:$0xff] }
 0x157   :  { %2989 = vtanh.f32 %v407_v43  ;;  %v4686_v43 = vld [vmem:[#allocation36_spill] sm:$0xff] }
 0x164   :  { %v2990_v30 = vpop.eup %2989 }
 0x165   :  { %v410_v46 = vmul.f32 %v2990_v30, %v409_v28  ;;  %v4689_v28 = vld [vmem:[#allocation39_spill] sm:$0xff]  ;;  %v4690_v30 = vld [vmem:[#allocation40_spill] sm:$0xff] }
 0x167   :  { %v3697_v40 = vadd.f32 %v411_v48, %v410_v46  ;;  %v4691_v46 = vld [vmem:[#allocation41_spill] sm:$0xff]  ;;  %v4692_v48 = vld [vmem:[#allocation42_spill] sm:$0xff] }
 0x169   :  { %413 = vst [vmem:[#allocation14] sm:$0xff] %v3697_v40  ;;  %2510 = vmatmul.mubr.f32.vlgmr.msra.gmra.mxu1 %v3697_v40  ;;  %549 = vmatmul.mubr.f32.vlgmr.msra.gmra.mxu0 %v3697_v40 }
 0x16a   :  { %2513 = vmatpush3.msra.mxu1 %v3546_v50  ;;  %2544 = vmatprep.mubr.msk.f32.mxu1 %vm3312_vm0, %v4676_v24 }
 0x16b   :  { %2514 = vmatprep.subr.mxu1 %v4676_v24  ;;  %2548 = vmatpush3.msra.mxu0 %v3388_v2 }
 0x16c   :  { %2515 = vmatpush3.msra.mxu1 %v3552_v51  ;;  %2549 = vmatprep.subr.mxu0 %v4676_v24 }
 0x16d   :  { %2516 = vmatprep.subr.mxu1 %v4676_v24  ;;  %2550 = vmatpush3.msra.mxu0 %v3396_v5 }
 0x16e   :  { %2517 = vmatpush3.msra.mxu1 %v3558_v52  ;;  %2551 = vmatprep.subr.mxu0 %v4676_v24 }
 0x16f   :  { %2518 = vmatprep.subr.mxu1 %v4676_v24  ;;  %2552 = vmatpush3.msra.mxu0 %v3404_v8 }
 0x170   :  { %2519 = vmatpush3.msra.mxu1 %v3564_v53  ;;  %2553 = vmatprep.subr.mxu0 %v4676_v24 }
 0x171   :  { %2520 = vmatprep.subr.mxu1 %v4676_v24  ;;  %2554 = vmatpush3.msra.mxu0 %v3414_v11 }
 0x172   :  { %2521 = vmatpush3.msra.mxu1 %v3570_v54  ;;  %2555 = vmatprep.subr.mxu0 %v4676_v24 }
 0x173   :  { %2522 = vmatprep.subr.mxu1 %v4676_v24  ;;  %2556 = vmatpush3.msra.mxu0 %v3424_v14 }
 0x174   :  { %2523 = vmatpush3.msra.mxu1 %v3576_v55  ;;  %2557 = vmatprep.subr.mxu0 %v4676_v24 }
 0x175   :  { %2524 = vmatprep.subr.mxu1 %v4676_v24  ;;  %2558 = vmatpush3.msra.mxu0 %v3434_v17 }
 0x176   :  { %2525 = vmatpush3.msra.mxu1 %v3582_v56  ;;  %2559 = vmatprep.subr.mxu0 %v4676_v24 }
 0x177   :  { %2526 = vmatprep.subr.mxu1 %v4676_v24  ;;  %2560 = vmatpush3.msra.mxu0 %v3444_v20 }
 0x178   :  { %2527 = vmatpush3.msra.mxu1 %v3588_v57  ;;  %2561 = vmatprep.subr.mxu0 %v4676_v24 }
 0x179   :  { %2528 = vmatprep.subr.mxu1 %v4676_v24  ;;  %2562 = vmatpush3.msra.mxu0 %v3454_v23 }
 0x17a   :  { %2529 = vmatpush3.msra.mxu1 %v3594_v58  ;;  %2563 = vmatprep.subr.mxu0 %v4676_v24 }
 0x17b   :  { %2530 = vmatprep.subr.mxu1 %v4676_v24  ;;  %2564 = vmatpush3.msra.mxu0 %v3464_v26 }
 0x17c   :  { %2531 = vmatpush3.msra.mxu1 %v3600_v59  ;;  %2565 = vmatprep.subr.mxu0 %v4676_v24 }
 0x17d   :  { %2532 = vmatprep.subr.mxu1 %v4676_v24  ;;  %2566 = vmatpush3.msra.mxu0 %v3474_v29 }
 0x17e   :  { %2533 = vmatpush3.msra.mxu1 %v4677_v27  ;;  %2567 = vmatprep.subr.mxu0 %v4676_v24 }
 0x17f   :  { %2534 = vmatprep.subr.mxu1 %v4676_v24  ;;  %2568 = vmatpush3.msra.mxu0 %v3484_v32 }
 0x180   :  { %2535 = vmatpush3.msra.mxu1 %v4678_v34  ;;  %2569 = vmatprep.subr.mxu0 %v4676_v24 }
 0x181   :  { %2536 = vmatprep.subr.mxu1 %v4676_v24  ;;  %2570 = vmatpush3.msra.mxu0 %v3494_v35 }
 0x182   :  { %2537 = vmatpush3.msra.mxu1 %v3618_v62  ;;  %2571 = vmatprep.subr.mxu0 %v4676_v24 }
 0x183   :  { %2538 = vmatprep.subr.mxu1 %v4676_v24  ;;  %2572 = vmatpush3.msra.mxu0 %v3504_v38 }
 0x184   :  { %2539 = vmatpush3.msra.mxu1 %v3624_v63  ;;  %2573 = vmatprep.subr.mxu0 %v4676_v24 }
 0x185   :  { %2540 = vmatprep.subr.mxu1 %v4676_v24  ;;  %2574 = vmatpush3.msra.mxu0 %v3514_v41 }
 0x186   :  { %2541 = vmatpush3.msra.mxu1 %v3630_v60  ;;  %2575 = vmatprep.subr.mxu0 %v4676_v24 }
 0x187   :  { %2542 = vmatprep.subr.mxu1 %v4676_v24  ;;  %2576 = vmatpush3.msra.mxu0 %v3524_v44 }
 0x188   :  { %2543 = vmatpush3.msra.mxu1 %v3636_v61  ;;  %2577 = vmatprep.subr.mxu0 %v4676_v24 }
 0x189   :  { %2545 = vmatmul.mubr.f32.vlgmr.msra.gmra.mxu1 %v3697_v40  ;;  %722 = vmatprep.subr.mxu1 %v3386_v1  ;;  %v4679_v40 = vld [vmem:[#allocation29_spill] sm:$0xff] }
 0x18a   :  { %723 = vmatpush1.msra.mxu1 %v3390_v3  ;;  %2578 = vmatpush3.msra.mxu0 %v3534_v47 }
 0x18b   :  { %724 = vmatprep.subr.mxu1 %v3394_v4  ;;  %2579 = vmatprep.mubr.msk.f32.mxu0 %vm3312_vm0, %v4676_v24 }
 0x18c   :  { %725 = vmatpush1.msra.mxu1 %v3398_v6  ;;  %786 = vmatprep.mubr.f32.mxu1 %v4676_v24 }
 0x18d   :  { %726 = vmatprep.subr.mxu1 %v3402_v7  ;;  %2582 = vmatprep.subr.mxu0 %v4676_v24 }
 0x18e   :  { %727 = vmatpush1.msra.mxu1 %v3408_v9 }
 0x18f   :  { %728 = vmatprep.subr.mxu1 %v3412_v10 }
 0x190   :  { %729 = vmatpush1.msra.mxu1 %v3418_v12 }
 0x191   :  { %730 = vmatprep.subr.mxu1 %v3422_v13 }
 0x192   :  { %731 = vmatpush1.msra.mxu1 %v3428_v15 }
 0x193   :  { %732 = vmatprep.subr.mxu1 %v3432_v16 }
 0x194   :  { %733 = vmatpush1.msra.mxu1 %v3438_v18 }
 0x195   :  { %734 = vmatprep.subr.mxu1 %v3442_v19 }
 0x196   :  { %735 = vmatpush1.msra.mxu1 %v3448_v21 }
 0x197   :  { %736 = vmatprep.subr.mxu1 %v3452_v22 }
 0x198   :  { %737 = vmatpush1.msra.mxu1 %v4679_v40 }
 0x199   :  { %738 = vmatprep.subr.mxu1 %v4680_v49 }
 0x19a   :  { %739 = vmatpush1.msra.mxu1 %v4681_v36 }
 0x19b   :  { %740 = vmatprep.subr.mxu1 %v4682_v33  ;;  %v4693_v33 = vld [vmem:[#allocation43_spill] sm:$0xff] }
 0x19c   :  { %741 = vmatpush1.msra.mxu1 %v4683_v37  ;;  %v4694_v37 = vld [vmem:[#allocation44_spill] sm:$0xff] }
 0x19d   :  { %742 = vmatprep.subr.mxu1 %v4684_v39  ;;  %v4695_v39 = vld [vmem:[#allocation45_spill] sm:$0xff] }
 0x19e   :  { %743 = vmatpush1.msra.mxu1 %v4685_v42  ;;  %v626_v42 = vld [vmem:[#allocation3 + $0x18] sm:$0xff] }
 0x19f   :  { %744 = vmatprep.subr.mxu1 %v4686_v43 }
 0x1a0   :  { %745 = vmatpush1.msra.mxu1 %v4687_v31 }
 0x1a1   :  { %746 = vmatprep.subr.mxu1 %v4688_v0  ;;  %v4696_v0 = vld [vmem:[#allocation48_spill] sm:$0xff] }
 0x1a2   :  { %747 = vmatpush1.msra.mxu1 %v4689_v28 }
 0x1a3   :  { %748 = vmatprep.subr.mxu1 %v4690_v30 }
 0x1a4   :  { %749 = vmatpush1.msra.mxu1 %v4691_v46  ;;  %v4697_v46 = vld [vmem:[#allocation49_spill] sm:$0xff] }
 0x1a5   :  { %750 = vmatprep.subr.mxu1 %v4692_v48  ;;  %v627_v48 = vld [vmem:[#allocation3 + $0x20] sm:$0xff] }
 0x1a6   :  { %751 = vmatpush1.msra.mxu1 %v4693_v33 }
 0x1a7   :  { %752 = vmatprep.subr.mxu1 %v4694_v37 }
 0x1a8   :  { %753 = vmatpush1.msra.mxu1 %v4695_v39 }
 0x1a9   :  { %2617 = vmatprep.subr.mxu1 %v4676_v24 }
 0x229   :  { %v480_v43 = vpop.f32.mrf.mxu1  ;;  %v550_v31 = vpop.f32.mrf.mxu0 }
 0x22a   :  { %v551_v36 = vadd.f32 %v550_v31, %v4696_v0  ;;  %v628_v0 = vld [vmem:[#allocation3 + $0x28] sm:$0xff] }
 0x22b   :  { %v2511_v28 = vpop.f32.mrf.mxu1  ;;  %v552_v49 = vpop.f32.mrf.mxu0 }
 0x22c   :  { %v629_v30 = vadd.f32 %v626_v42, %v551_v36  ;;  %v553_v22 = vadd.f32 %v552_v49, %v4697_v46 }
 0x22e   :  { %v2121_v40 = vmul.f32 -1.442695, %v629_v30  ;;  %v636_v33 = vadd.f32 %v627_v48, %v553_v22  ;;  %v481_v22 = vadd.f32 %v480_v43, %v3694_v45 }
 0x230   :  { %2991 = vpow2.f32 %v2121_v40  ;;  %v2122_v21 = vmul.f32 -1.442695, %v636_v33 }
 0x232   :  { %2993 = vpow2.f32 %v2122_v21 }
 0x23d   :  { %v2992_v37 = vpop.eup %2991 }
 0x23e   :  { %v633_v39 = vadd.f32 1.0, %v2992_v37 }
 0x23f   :  { %v2994_v19 = vpop.eup %2993 }
 0x240   :  { %2995 = vrcp.f32 %v633_v39  ;;  %v640_v16 = vadd.f32 1.0, %v2994_v19  ;;  %v4716_v19 = vld [vmem:[#allocation41_spill] sm:$0xff] }
 0x242   :  { %2997 = vrcp.f32 %v640_v16  ;;  %v4713_v16 = vld [vmem:[#allocation38_spill] sm:$0xff] }
 0x249   :  { %v621_v18 = vpop.f32.mrf.mxu1 }
 0x24a   :  { %v622_v31 = vadd.f32 %v621_v18, %v3691_v25  ;;  %v4715_v18 = vld [vmem:[#allocation40_spill] sm:$0xff] }
 0x24b   :  { %v2546_v15 = vpop.f32.mrf.mxu1 }
 0x24c   :  { %v4712_v15 = vld [vmem:[#allocation37_spill] sm:$0xff] }
 0x24d   :  { %v2996_v28 = vpop.eup %2995 }
 0x24e   :  { %v643_v36 = vmul.f32 %v2996_v28, %v622_v31  ;;  %v865_v31 = vld [vmem:[#allocation3 + $0x38] sm:$0xff] }
 0x24f   :  { %v2998_v49 = vpop.eup %2997 }
 0x250   :  { %v644_v42 = vadd.f32 %v643_v36, %v628_v0  ;;  %v646_v40 = vsub.f32 1.0, %v2998_v49  ;;  %v648_v37 = vmul.f32 %v2998_v49, %v481_v22 }
 0x252   :  { %2999 = vtanh.f32 %v644_v42 }
 0x25f   :  { %v3000_v21 = vpop.eup %2999 }
 0x260   :  { %v647_v33 = vmul.f32 %v3000_v21, %v646_v40 }
 0x262   :  { %v3808_v39 = vadd.f32 %v648_v37, %v647_v33 }
 0x264   :  { %651 = vst [vmem:[#allocation14 + $0x8] sm:$0xff] %v3808_v39  ;;  %2580 = vmatmul.mubr.f32.vlgmr.msra.gmra.mxu0 %v3808_v39  ;;  %787 = vmatmul.mubr.f32.vlgmr.msra.gmra.mxu1 %v3808_v39 }
 0x265   :  { %2583 = vmatpush3.msra.mxu0 %v3546_v50  ;;  %2614 = vmatprep.mubr.msk.f32.mxu0 %vm3312_vm0, %v4676_v24 }
 0x266   :  { %2584 = vmatprep.subr.mxu0 %v4676_v24  ;;  %2618 = vmatpush3.msra.mxu1 %v3388_v2  ;;  %v4699_v2 = vld [vmem:[#allocation24_spill] sm:$0xff] }
 0x267   :  { %2585 = vmatpush3.msra.mxu0 %v3552_v51  ;;  %2619 = vmatprep.subr.mxu1 %v4676_v24 }
 0x268   :  { %2586 = vmatprep.subr.mxu0 %v4676_v24  ;;  %2620 = vmatpush3.msra.mxu1 %v3396_v5  ;;  %v4702_v5 = vld [vmem:[#allocation27_spill] sm:$0xff] }
 0x269   :  { %2587 = vmatpush3.msra.mxu0 %v3558_v52  ;;  %2621 = vmatprep.subr.mxu1 %v4676_v24 }
 0x26a   :  { %2588 = vmatprep.subr.mxu0 %v4676_v24  ;;  %2622 = vmatpush3.msra.mxu1 %v3404_v8  ;;  %v4705_v8 = vld [vmem:[#allocation30_spill] sm:$0xff] }
 0x26b   :  { %2589 = vmatpush3.msra.mxu0 %v3564_v53  ;;  %2623 = vmatprep.subr.mxu1 %v4676_v24 }
 0x26c   :  { %2590 = vmatprep.subr.mxu0 %v4676_v24  ;;  %2624 = vmatpush3.msra.mxu1 %v3414_v11  ;;  %v4708_v11 = vld [vmem:[#allocation33_spill] sm:$0xff] }
 0x26d   :  { %2591 = vmatpush3.msra.mxu0 %v3570_v54  ;;  %2625 = vmatprep.subr.mxu1 %v4676_v24 }
 0x26e   :  { %2592 = vmatprep.subr.mxu0 %v4676_v24  ;;  %2626 = vmatpush3.msra.mxu1 %v3424_v14  ;;  %v4711_v14 = vld [vmem:[#allocation36_spill] sm:$0xff] }
 0x26f   :  { %2593 = vmatpush3.msra.mxu0 %v3576_v55  ;;  %2627 = vmatprep.subr.mxu1 %v4676_v24 }
 0x270   :  { %2594 = vmatprep.subr.mxu0 %v4676_v24  ;;  %2628 = vmatpush3.msra.mxu1 %v3434_v17  ;;  %v4714_v17 = vld [vmem:[#allocation39_spill] sm:$0xff] }
 0x271   :  { %2595 = vmatpush3.msra.mxu0 %v3582_v56  ;;  %2629 = vmatprep.subr.mxu1 %v4676_v24 }
 0x272   :  { %2596 = vmatprep.subr.mxu0 %v4676_v24  ;;  %2630 = vmatpush3.msra.mxu1 %v3444_v20  ;;  %v4717_v20 = vld [vmem:[#allocation42_spill] sm:$0xff] }
 0x273   :  { %2597 = vmatpush3.msra.mxu0 %v3588_v57  ;;  %2631 = vmatprep.subr.mxu1 %v4676_v24 }
 0x274   :  { %2598 = vmatprep.subr.mxu0 %v4676_v24  ;;  %2632 = vmatpush3.msra.mxu1 %v3454_v23  ;;  %v4718_v23 = vld [vmem:[#allocation43_spill] sm:$0xff] }
 0x275   :  { %2599 = vmatpush3.msra.mxu0 %v3594_v58  ;;  %2633 = vmatprep.subr.mxu1 %v4676_v24 }
 0x276   :  { %2600 = vmatprep.subr.mxu0 %v4676_v24  ;;  %2634 = vmatpush3.msra.mxu1 %v3464_v26  ;;  %v4719_v26 = vld [vmem:[#allocation44_spill] sm:$0xff] }
 0x277   :  { %2601 = vmatpush3.msra.mxu0 %v3600_v59  ;;  %2635 = vmatprep.subr.mxu1 %v4676_v24 }
 0x278   :  { %2602 = vmatprep.subr.mxu0 %v4676_v24  ;;  %2636 = vmatpush3.msra.mxu1 %v3474_v29  ;;  %v4720_v29 = vld [vmem:[#allocation45_spill] sm:$0xff] }
 0x279   :  { %2603 = vmatpush3.msra.mxu0 %v4677_v27  ;;  %2637 = vmatprep.subr.mxu1 %v4676_v24 }
 0x27a   :  { %2604 = vmatprep.subr.mxu0 %v4676_v24  ;;  %2638 = vmatpush3.msra.mxu1 %v3484_v32 }
 0x27b   :  { %2605 = vmatpush3.msra.mxu0 %v4678_v34  ;;  %2639 = vmatprep.subr.mxu1 %v4676_v24 }
 0x27c   :  { %2606 = vmatprep.subr.mxu0 %v4676_v24  ;;  %2640 = vmatpush3.msra.mxu1 %v3494_v35 }
 0x27d   :  { %2607 = vmatpush3.msra.mxu0 %v3618_v62  ;;  %2641 = vmatprep.subr.mxu1 %v4676_v24 }
 0x27e   :  { %2608 = vmatprep.subr.mxu0 %v4676_v24  ;;  %2642 = vmatpush3.msra.mxu1 %v3504_v38  ;;  %v864_v38 = vld [vmem:[#allocation3 + $0x30] sm:$0xff] }
 0x27f   :  { %2609 = vmatpush3.msra.mxu0 %v3624_v63  ;;  %2643 = vmatprep.subr.mxu1 %v4676_v24 }
 0x280   :  { %2610 = vmatprep.subr.mxu0 %v4676_v24  ;;  %2644 = vmatpush3.msra.mxu1 %v3514_v41  ;;  %v4721_v41 = vld [vmem:[#allocation48_spill] sm:$0xff] }
 0x281   :  { %2611 = vmatpush3.msra.mxu0 %v3630_v60  ;;  %2645 = vmatprep.subr.mxu1 %v4676_v24 }
 0x282   :  { %2612 = vmatprep.subr.mxu0 %v4676_v24  ;;  %2646 = vmatpush3.msra.mxu1 %v3524_v44 }
 0x283   :  { %2613 = vmatpush3.msra.mxu0 %v3636_v61  ;;  %2647 = vmatprep.subr.mxu1 %v4676_v24 }
 0x284   :  { %2615 = vmatmul.mubr.f32.vlgmr.msra.gmra.mxu0 %v3808_v39  ;;  %960 = vmatprep.subr.mxu0 %v3386_v1  ;;  %v4698_v1 = vld [vmem:[#allocation23_spill] sm:$0xff] }
 0x285   :  { %961 = vmatpush1.msra.mxu0 %v3390_v3  ;;  %2648 = vmatpush3.msra.mxu1 %v3534_v47  ;;  %v4700_v3 = vld [vmem:[#allocation25_spill] sm:$0xff] }
 0x286   :  { %962 = vmatprep.subr.mxu0 %v3394_v4  ;;  %2649 = vmatprep.mubr.msk.f32.mxu1 %vm3312_vm0, %v4676_v24  ;;  %v4701_v4 = vld [vmem:[#allocation26_spill] sm:$0xff] }
 0x287   :  { %963 = vmatpush1.msra.mxu0 %v3398_v6  ;;  %1024 = vmatprep.mubr.f32.mxu0 %v4676_v24  ;;  %v4703_v6 = vld [vmem:[#allocation28_spill] sm:$0xff] }
 0x288   :  { %964 = vmatprep.subr.mxu0 %v3402_v7  ;;  %2652 = vmatprep.subr.mxu1 %v4676_v24  ;;  %v4704_v7 = vld [vmem:[#allocation29_spill] sm:$0xff] }
 0x289   :  { %965 = vmatpush1.msra.mxu0 %v3408_v9  ;;  %v4706_v9 = vld [vmem:[#allocation31_spill] sm:$0xff] }
 0x28a   :  { %966 = vmatprep.subr.mxu0 %v3412_v10  ;;  %v4707_v10 = vld [vmem:[#allocation32_spill] sm:$0xff] }
 0x28b   :  { %967 = vmatpush1.msra.mxu0 %v3418_v12  ;;  %v4709_v12 = vld [vmem:[#allocation34_spill] sm:$0xff] }
 0x28c   :  { %968 = vmatprep.subr.mxu0 %v3422_v13  ;;  %v4710_v13 = vld [vmem:[#allocation35_spill] sm:$0xff] }
 0x28d   :  { %969 = vmatpush1.msra.mxu0 %v4698_v1  ;;  %v866_v1 = vld [vmem:[#allocation3 + $0x40] sm:$0xff] }
 0x28e   :  { %970 = vmatprep.subr.mxu0 %v4699_v2 }
 0x28f   :  { %971 = vmatpush1.msra.mxu0 %v4700_v3 }
 0x290   :  { %972 = vmatprep.subr.mxu0 %v4701_v4 }
 0x291   :  { %973 = vmatpush1.msra.mxu0 %v4702_v5 }
 0x292   :  { %974 = vmatprep.subr.mxu0 %v4703_v6 }
 0x293   :  { %975 = vmatpush1.msra.mxu0 %v4704_v7 }
 0x294   :  { %976 = vmatprep.subr.mxu0 %v4705_v8 }
 0x295   :  { %977 = vmatpush1.msra.mxu0 %v4706_v9 }
 0x296   :  { %978 = vmatprep.subr.mxu0 %v4707_v10 }
 0x297   :  { %979 = vmatpush1.msra.mxu0 %v4708_v11  ;;  %v3928_v11 = vld [vmem:[#allocation11 + $0x78] sm:$0xff] }
 0x298   :  { %980 = vmatprep.subr.mxu0 %v4709_v12  ;;  %v3934_v12 = vld [vmem:[#allocation11 + $0x70] sm:$0xff] }
 0x299   :  { %981 = vmatpush1.msra.mxu0 %v4710_v13  ;;  %v4021_v13 = vld [vmem:[#allocation12 + $0x168] sm:$0xff] }
 0x29a   :  { %982 = vmatprep.subr.mxu0 %v4711_v14  ;;  %v4027_v14 = vld [vmem:[#allocation12 + $0x158] sm:$0xff] }
 0x29b   :  { %983 = vmatpush1.msra.mxu0 %v4712_v15  ;;  %v4036_v15 = vld [vmem:[#allocation12 + $0x140] sm:$0xff] }
 0x29c   :  { %984 = vmatprep.subr.mxu0 %v4713_v16  ;;  %v4040_v16 = vld [vmem:[#allocation12 + $0x138] sm:$0xff] }
 0x29d   :  { %985 = vmatpush1.msra.mxu0 %v4714_v17  ;;  %v4043_v17 = vld [vmem:[#allocation12 + $0x128] sm:$0xff] }
 0x29e   :  { %986 = vmatprep.subr.mxu0 %v4715_v18  ;;  %v4046_v18 = vld [vmem:[#allocation12 + $0x120] sm:$0xff] }
 0x29f   :  { %987 = vmatpush1.msra.mxu0 %v4716_v19  ;;  %v4049_v19 = vld [vmem:[#allocation12 + $0x110] sm:$0xff] }
 0x2a0   :  { %988 = vmatprep.subr.mxu0 %v4717_v20  ;;  %v4052_v20 = vld [vmem:[#allocation12 + $0x108] sm:$0xff] }
 0x2a1   :  { %989 = vmatpush1.msra.mxu0 %v4718_v23  ;;  %4722 = vst [vmem:[#allocation46_spill] sm:$0xff] %v4052_v20  ;;  %v4055_v23 = vld [vmem:[#allocation12 + $0xf8] sm:$0xff] }
 0x2a2   :  { %990 = vmatprep.subr.mxu0 %v4719_v26  ;;  %4723 = vst [vmem:[#allocation47_spill] sm:$0xff] %v4055_v23  ;;  %v4058_v26 = vld [vmem:[#allocation12 + $0xf0] sm:$0xff] }
 0x2a3   :  { %991 = vmatpush1.msra.mxu0 %v4720_v29  ;;  %4724 = vst [vmem:[#allocation49_spill] sm:$0xff] %v4058_v26  ;;  %v4061_v29 = vld [vmem:[#allocation12 + $0xe0] sm:$0xff] }
 0x2a4   :  { %2687 = vmatprep.subr.mxu0 %v4676_v24  ;;  %4725 = vst [vmem:[#allocation23_spill] sm:$0xff] %v4061_v29 }
 0x324   :  { %v718_v32 = vpop.f32.mrf.mxu0  ;;  %v788_v35 = vpop.f32.mrf.mxu1 }
 0x325   :  { %v789_v44 = vadd.f32 %v788_v35, %v4721_v41  ;;  %v719_v5 = vadd.f32 %v718_v32, %v3694_v45  ;;  %v4064_v32 = vld [vmem:[#allocation12 + $0xd8] sm:$0xff]  ;;  %v4067_v35 = vld [vmem:[#allocation12 + $0xc8] sm:$0xff] }
 0x326   :  { %v2581_v47 = vpop.f32.mrf.mxu0  ;;  %v790_v43 = vpop.f32.mrf.mxu1  ;;  %4726 = vst [vmem:[#allocation24_spill] sm:$0xff] %v4064_v32  ;;  %4727 = vst [vmem:[#allocation25_spill] sm:$0xff] %v4067_v35 }
 0x327   :  { %v867_v0 = vadd.f32 %v864_v38, %v789_v44  ;;  %v791_v48 = vadd.f32 %v790_v43, %v4697_v46  ;;  %v4070_v38 = vld [vmem:[#allocation12 + $0xc0] sm:$0xff]  ;;  %v4073_v44 = vld [vmem:[#allocation12 + $0xb0] sm:$0xff]  ;;  %v4076_v47 = vld [vmem:[#allocation12 + $0xa8] sm:$0xff] }
 0x328   :  { %4728 = vst [vmem:[#allocation26_spill] sm:$0xff] %v4070_v38  ;;  %4729 = vst [vmem:[#allocation27_spill] sm:$0xff] %v4073_v44  ;;  %v4079_v43 = vld [vmem:[#allocation12 + $0x98] sm:$0xff] }
 0x329   :  { %v2123_v30 = vmul.f32 -1.442695, %v867_v0  ;;  %v874_v28 = vadd.f32 %v865_v31, %v791_v48  ;;  %4730 = vst [vmem:[#allocation28_spill] sm:$0xff] %v4076_v47  ;;  %4731 = vst [vmem:[#allocation29_spill] sm:$0xff] %v4079_v43  ;;  %v4082_v0 = vld [vmem:[#allocation12 + $0x90] sm:$0xff]  ;;  %v4088_v48 = vld [vmem:[#allocation12 + $0x78] sm:$0xff] }
 0x32a   :  { %4732 = vst [vmem:[#allocation30_spill] sm:$0xff] %v4082_v0  ;;  %4734 = vst [vmem:[#allocation32_spill] sm:$0xff] %v4088_v48  ;;  %v4091_v31 = vld [vmem:[#allocation12 + $0x68] sm:$0xff] }
 0x32b   :  { %3001 = vpow2.f32 %v2123_v30  ;;  %v2124_v36 = vmul.f32 -1.442695, %v874_v28  ;;  %v4085_v30 = vld [vmem:[#allocation12 + $0x80] sm:$0xff]  ;;  %4735 = vst [vmem:[#allocation33_spill] sm:$0xff] %v4091_v31 }
 0x32c   :  { %4733 = vst [vmem:[#allocation31_spill] sm:$0xff] %v4085_v30  ;;  %v4094_v28 = vld [vmem:[#allocation12 + $0x60] sm:$0xff] }
 0x32d   :  { %3003 = vpow2.f32 %v2124_v36  ;;  %4736 = vst [vmem:[#allocation34_spill] sm:$0xff] %v4094_v28  ;;  %v4097_v36 = vld [vmem:[#allocation12 + $0x50] sm:$0xff] }
 0x32e   :  { %4737 = vst [vmem:[#allocation35_spill] sm:$0xff] %v4097_v36 }
 0x338   :  { %v3002_v42 = vpop.eup %3001 }
 0x339   :  { %v871_v49 = vadd.f32 1.0, %v3002_v42  ;;  %v4100_v42 = vld [vmem:[#allocation12 + $0x48] sm:$0xff] }
 0x33a   :  { %v3004_v22 = vpop.eup %3003  ;;  %4738 = vst [vmem:[#allocation36_spill] sm:$0xff] %v4100_v42 }
 0x33b   :  { %3005 = vrcp.f32 %v871_v49  ;;  %v878_v21 = vadd.f32 1.0, %v3004_v22  ;;  %v4103_v49 = vld [vmem:[#allocation12 + $0x38] sm:$0xff]  ;;  %v4106_v22 = vld [vmem:[#allocation12 + $0x30] sm:$0xff] }
 0x33c   :  { %4739 = vst [vmem:[#allocation37_spill] sm:$0xff] %v4103_v49  ;;  %4740 = vst [vmem:[#allocation38_spill] sm:$0xff] %v4106_v22 }
 0x33d   :  { %3007 = vrcp.f32 %v878_v21  ;;  %v4112_v21 = vld [vmem:[#allocation12 + $0x18] sm:$0xff] }
 0x33e   :  { %4742 = vst [vmem:[#allocation40_spill] sm:$0xff] %v4112_v21 }
 0x344   :  { %v859_v40 = vpop.f32.mrf.mxu0 }
 0x345   :  { %v860_v37 = vadd.f32 %v859_v40, %v3691_v25  ;;  %v4109_v40 = vld [vmem:[#allocation12 + $0x20] sm:$0xff] }
 0x346   :  { %v2616_v33 = vpop.f32.mrf.mxu0  ;;  %4741 = vst [vmem:[#allocation39_spill] sm:$0xff] %v4109_v40 }
 0x347   :  { %v4115_v33 = vld [vmem:[#allocation12 + $0x8] sm:$0xff] }
 0x348   :  { %v3006_v39 = vpop.eup %3005  ;;  %4743 = vst [vmem:[#allocation41_spill] sm:$0xff] %v4115_v33 }
 0x349   :  { %v881_v2 = vmul.f32 %v3006_v39, %v860_v37  ;;  %v4118_v37 = vld [vmem:[#allocation12] sm:$0xff] }
 0x34a   :  { %v3008_v4 = vpop.eup %3007  ;;  %4744 = vst [vmem:[#allocation42_spill] sm:$0xff] %v4118_v37 }
 0x34b   :  { %v882_v3 = vadd.f32 %v881_v2, %v866_v1  ;;  %v884_v6 = vsub.f32 1.0, %v3008_v4  ;;  %v886_v9 = vmul.f32 %v3008_v4, %v719_v5  ;;  %v1102_v2 = vld [vmem:[#allocation3 + $0x48] sm:$0xff] }
 0x34d   :  { %3009 = vtanh.f32 %v882_v3 }
 0x35a   :  { %v3010_v7 = vpop.eup %3009 }
 0x35b   :  { %v885_v8 = vmul.f32 %v3010_v7, %v884_v6 }
 0x35d   :  { %v3919_v10 = vadd.f32 %v886_v9, %v885_v8  ;;  %v1103_v9 = vld [vmem:[#allocation3 + $0x50] sm:$0xff] }
 0x35f   :  { %889 = vst [vmem:[#allocation14 + $0x10] sm:$0xff] %v3919_v10  ;;  %2650 = vmatmul.mubr.f32.vlgmr.msra.gmra.mxu1 %v3919_v10  ;;  %1025 = vmatmul.mubr.f32.vlgmr.msra.gmra.mxu0 %v3919_v10 }
 0x360   :  { %2653 = vmatpush3.msra.mxu1 %v3546_v50  ;;  %2684 = vmatprep.mubr.msk.f32.mxu1 %vm3312_vm0, %v4676_v24  ;;  %v3940_v50 = vld [vmem:[#allocation11 + $0x68] sm:$0xff] }
 0x361   :  { %2654 = vmatprep.subr.mxu1 %v4676_v24  ;;  %2688 = vmatpush3.msra.mxu0 %v3928_v11 }
 0x362   :  { %2655 = vmatpush3.msra.mxu1 %v3552_v51  ;;  %2689 = vmatprep.subr.mxu0 %v4676_v24  ;;  %v3946_v51 = vld [vmem:[#allocation11 + $0x60] sm:$0xff] }
 0x363   :  { %2656 = vmatprep.subr.mxu1 %v4676_v24  ;;  %2690 = vmatpush3.msra.mxu0 %v3934_v12 }
 0x364   :  { %2657 = vmatpush3.msra.mxu1 %v3558_v52  ;;  %2691 = vmatprep.subr.mxu0 %v4676_v24  ;;  %v3952_v52 = vld [vmem:[#allocation11 + $0x58] sm:$0xff] }
 0x365   :  { %2658 = vmatprep.subr.mxu1 %v4676_v24  ;;  %2692 = vmatpush3.msra.mxu0 %v3940_v50 }
 0x366   :  { %2659 = vmatpush3.msra.mxu1 %v3564_v53  ;;  %2693 = vmatprep.subr.mxu0 %v4676_v24  ;;  %v3958_v53 = vld [vmem:[#allocation11 + $0x50] sm:$0xff] }
 0x367   :  { %2660 = vmatprep.subr.mxu1 %v4676_v24  ;;  %2694 = vmatpush3.msra.mxu0 %v3946_v51 }
 0x368   :  { %2661 = vmatpush3.msra.mxu1 %v3570_v54  ;;  %2695 = vmatprep.subr.mxu0 %v4676_v24  ;;  %v3964_v54 = vld [vmem:[#allocation11 + $0x48] sm:$0xff] }
 0x369   :  { %2662 = vmatprep.subr.mxu1 %v4676_v24  ;;  %2696 = vmatpush3.msra.mxu0 %v3952_v52 }
 0x36a   :  { %2663 = vmatpush3.msra.mxu1 %v3576_v55  ;;  %2697 = vmatprep.subr.mxu0 %v4676_v24  ;;  %v3970_v55 = vld [vmem:[#allocation11 + $0x40] sm:$0xff] }
 0x36b   :  { %2664 = vmatprep.subr.mxu1 %v4676_v24  ;;  %2698 = vmatpush3.msra.mxu0 %v3958_v53 }
 0x36c   :  { %2665 = vmatpush3.msra.mxu1 %v3582_v56  ;;  %2699 = vmatprep.subr.mxu0 %v4676_v24  ;;  %v3976_v56 = vld [vmem:[#allocation11 + $0x38] sm:$0xff] }
 0x36d   :  { %2666 = vmatprep.subr.mxu1 %v4676_v24  ;;  %2700 = vmatpush3.msra.mxu0 %v3964_v54 }
 0x36e   :  { %2667 = vmatpush3.msra.mxu1 %v3588_v57  ;;  %2701 = vmatprep.subr.mxu0 %v4676_v24  ;;  %v3982_v57 = vld [vmem:[#allocation11 + $0x30] sm:$0xff] }
 0x36f   :  { %2668 = vmatprep.subr.mxu1 %v4676_v24  ;;  %2702 = vmatpush3.msra.mxu0 %v3970_v55 }
 0x370   :  { %2669 = vmatpush3.msra.mxu1 %v3594_v58  ;;  %2703 = vmatprep.subr.mxu0 %v4676_v24  ;;  %v3988_v58 = vld [vmem:[#allocation11 + $0x28] sm:$0xff] }
 0x371   :  { %2670 = vmatprep.subr.mxu1 %v4676_v24  ;;  %2704 = vmatpush3.msra.mxu0 %v3976_v56 }
 0x372   :  { %2671 = vmatpush3.msra.mxu1 %v3600_v59  ;;  %2705 = vmatprep.subr.mxu0 %v4676_v24  ;;  %v3994_v59 = vld [vmem:[#allocation11 + $0x20] sm:$0xff] }
 0x373   :  { %2672 = vmatprep.subr.mxu1 %v4676_v24  ;;  %2706 = vmatpush3.msra.mxu0 %v3982_v57 }
 0x374   :  { %2673 = vmatpush3.msra.mxu1 %v4677_v27  ;;  %2707 = vmatprep.subr.mxu0 %v4676_v24  ;;  %v4000_v27 = vld [vmem:[#allocation11 + $0x18] sm:$0xff] }
 0x375   :  { %2674 = vmatprep.subr.mxu1 %v4676_v24  ;;  %2708 = vmatpush3.msra.mxu0 %v3988_v58 }
 0x376   :  { %2675 = vmatpush3.msra.mxu1 %v4678_v34  ;;  %2709 = vmatprep.subr.mxu0 %v4676_v24  ;;  %v4006_v34 = vld [vmem:[#allocation11 + $0x10] sm:$0xff] }
 0x377   :  { %2676 = vmatprep.subr.mxu1 %v4676_v24  ;;  %2710 = vmatpush3.msra.mxu0 %v3994_v59 }
 0x378   :  { %2677 = vmatpush3.msra.mxu1 %v3618_v62  ;;  %2711 = vmatprep.subr.mxu0 %v4676_v24  ;;  %v4012_v62 = vld [vmem:[#allocation11 + $0x8] sm:$0xff] }
 0x379   :  { %2678 = vmatprep.subr.mxu1 %v4676_v24  ;;  %2712 = vmatpush3.msra.mxu0 %v4000_v27 }
 0x37a   :  { %2679 = vmatpush3.msra.mxu1 %v3624_v63  ;;  %2713 = vmatprep.subr.mxu0 %v4676_v24  ;;  %v4018_v63 = vld [vmem:[#allocation12 + $0x170] sm:$0xff] }
 0x37b   :  { %2680 = vmatprep.subr.mxu1 %v4676_v24  ;;  %2714 = vmatpush3.msra.mxu0 %v4006_v34 }
 0x37c   :  { %2681 = vmatpush3.msra.mxu1 %v3630_v60  ;;  %2715 = vmatprep.subr.mxu0 %v4676_v24  ;;  %v4024_v60 = vld [vmem:[#allocation11] sm:$0xff] }
 0x37d   :  { %2682 = vmatprep.subr.mxu1 %v4676_v24  ;;  %2716 = vmatpush3.msra.mxu0 %v4012_v62 }
 0x37e   :  { %2683 = vmatpush3.msra.mxu1 %v3636_v61  ;;  %2717 = vmatprep.subr.mxu0 %v4676_v24  ;;  %v4032_v61 = vld [vmem:[#allocation12 + $0x150] sm:$0xff] }
 0x37f   :  { %2685 = vmatmul.mubr.f32.vlgmr.msra.gmra.mxu1 %v3919_v10  ;;  %1198 = vmatprep.subr.mxu1 %v4018_v63 }
 0x380   :  { %1199 = vmatpush1.msra.mxu1 %v4021_v13  ;;  %2718 = vmatpush3.msra.mxu0 %v4024_v60 }
 0x381   :  { %1200 = vmatprep.subr.mxu1 %v4027_v14  ;;  %2719 = vmatprep.mubr.msk.f32.mxu0 %vm3312_vm0, %v4676_v24 }
 0x382   :  { %1201 = vmatpush1.msra.mxu1 %v4032_v61  ;;  %1262 = vmatprep.mubr.f32.mxu1 %v4676_v24 }
 0x383   :  { %1202 = vmatprep.subr.mxu1 %v4036_v15  ;;  %2722 = vmatprep.subr.mxu0 %v4676_v24 }
 0x384   :  { %1203 = vmatpush1.msra.mxu1 %v4040_v16 }
 0x385   :  { %1204 = vmatprep.subr.mxu1 %v4043_v17 }
 0x386   :  { %1205 = vmatpush1.msra.mxu1 %v4046_v18 }
 0x387   :  { %1206 = vmatprep.subr.mxu1 %v4049_v19 }
 0x388   :  { %1207 = vmatpush1.msra.mxu1 %v4052_v20 }
 0x389   :  { %1208 = vmatprep.subr.mxu1 %v4055_v23 }
 0x38a   :  { %1209 = vmatpush1.msra.mxu1 %v4058_v26 }
 0x38b   :  { %1210 = vmatprep.subr.mxu1 %v4061_v29 }
 0x38c   :  { %1211 = vmatpush1.msra.mxu1 %v4064_v32 }
 0x38d   :  { %1212 = vmatprep.subr.mxu1 %v4067_v35 }
 0x38e   :  { %1213 = vmatpush1.msra.mxu1 %v4070_v38 }
 0x38f   :  { %1214 = vmatprep.subr.mxu1 %v4073_v44 }
 0x390   :  { %1215 = vmatpush1.msra.mxu1 %v4076_v47 }
 0x391   :  { %1216 = vmatprep.subr.mxu1 %v4079_v43 }
 0x392   :  { %1217 = vmatpush1.msra.mxu1 %v4082_v0 }
 0x393   :  { %1218 = vmatprep.subr.mxu1 %v4085_v30 }
 0x394   :  { %1219 = vmatpush1.msra.mxu1 %v4088_v48 }
 0x395   :  { %1220 = vmatprep.subr.mxu1 %v4091_v31 }
 0x396   :  { %1221 = vmatpush1.msra.mxu1 %v4094_v28 }
 0x397   :  { %1222 = vmatprep.subr.mxu1 %v4097_v36 }
 0x398   :  { %1223 = vmatpush1.msra.mxu1 %v4100_v42 }
 0x399   :  { %1224 = vmatprep.subr.mxu1 %v4103_v49 }
 0x39a   :  { %1225 = vmatpush1.msra.mxu1 %v4106_v22 }
 0x39b   :  { %1226 = vmatprep.subr.mxu1 %v4109_v40 }
 0x39c   :  { %1227 = vmatpush1.msra.mxu1 %v4112_v21 }
 0x39d   :  { %1228 = vmatprep.subr.mxu1 %v4115_v33 }
 0x39e   :  { %1229 = vmatpush1.msra.mxu1 %v4118_v37 }
 0x39f   :  { %2757 = vmatprep.subr.mxu1 %v4676_v24 }
 0x41f   :  { %v956_v39 = vpop.f32.mrf.mxu1  ;;  %v1026_v1 = vpop.f32.mrf.mxu0 }
 0x420   :  { %v1027_v3 = vadd.f32 %v1026_v1, %v4721_v41 }
 0x421   :  { %v2651_v4 = vpop.f32.mrf.mxu1  ;;  %v1028_v5 = vpop.f32.mrf.mxu0 }
 0x422   :  { %v1105_v6 = vadd.f32 %v1102_v2, %v1027_v3  ;;  %v1029_v8 = vadd.f32 %v1028_v5, %v4697_v46  ;;  %v1104_v4 = vld [vmem:[#allocation3 + $0x58] sm:$0xff]  ;;  %v957_v5 = vadd.f32 %v956_v39, %v3694_v45  ;;  %v4138_v45 = vld [vmem:[#allocation12 + $0x160] sm:$0xff]  ;;  %v4168_v39 = vld [vmem:[#allocation12 + $0xe8] sm:$0xff] }
 0x424   :  { %v2125_v7 = vmul.f32 -1.442695, %v1105_v6  ;;  %v1112_v10 = vadd.f32 %v1103_v9, %v1029_v8  ;;  %v4174_v8 = vld [vmem:[#allocation12 + $0xd0] sm:$0xff]  ;;  %v4180_v9 = vld [vmem:[#allocation12 + $0xb8] sm:$0xff] }
 0x426   :  { %3011 = vpow2.f32 %v2125_v7  ;;  %v2126_v33 = vmul.f32 -1.442695, %v1112_v10  ;;  %v4186_v10 = vld [vmem:[#allocation12 + $0xa0] sm:$0xff] }
 0x428   :  { %3013 = vpow2.f32 %v2126_v33 }
 0x433   :  { %v3012_v21 = vpop.eup %3011 }
 0x434   :  { %v1109_v37 = vadd.f32 1.0, %v3012_v21 }
 0x435   :  { %v3014_v40 = vpop.eup %3013 }
 0x436   :  { %3015 = vrcp.f32 %v1109_v37  ;;  %v1116_v49 = vadd.f32 1.0, %v3014_v40  ;;  %v4162_v40 = vld [vmem:[#allocation12 + $0x100] sm:$0xff] }
 0x438   :  { %3017 = vrcp.f32 %v1116_v49  ;;  %v4150_v49 = vld [vmem:[#allocation12 + $0x130] sm:$0xff] }
 0x43f   :  { %v1097_v22 = vpop.f32.mrf.mxu1 }
 0x440   :  { %v1098_v41 = vadd.f32 %v1097_v22, %v3691_v25  ;;  %v4131_v25 = vld [vmem:[#allocation12 + $0x178] sm:$0xff] }
 0x441   :  { %v2686_v42 = vpop.f32.mrf.mxu1  ;;  %v4156_v22 = vld [vmem:[#allocation12 + $0x118] sm:$0xff] }
 0x442   :  { %v4144_v42 = vld [vmem:[#allocation12 + $0x148] sm:$0xff] }
 0x443   :  { %v3016_v1 = vpop.eup %3015 }
 0x444   :  { %v1119_v2 = vmul.f32 %v3016_v1, %v1098_v41  ;;  %v4192_v41 = vld [vmem:[#allocation12 + $0x88] sm:$0xff]  ;;  %v4198_v1 = vld [vmem:[#allocation12 + $0x70] sm:$0xff] }
 0x445   :  { %v3018_v46 = vpop.eup %3017 }
 0x446   :  { %v1120_v3 = vadd.f32 %v1119_v2, %v1104_v4  ;;  %v1122_v6 = vsub.f32 1.0, %v3018_v46  ;;  %v1124_v21 = vmul.f32 %v3018_v46, %v957_v5  ;;  %v4204_v4 = vld [vmem:[#allocation12 + $0x58] sm:$0xff]  ;;  %v4210_v2 = vld [vmem:[#allocation12 + $0x40] sm:$0xff]  ;;  %v4222_v46 = vld [vmem:[#allocation12 + $0x10] sm:$0xff] }
 0x447   :  { %v4745_v5 = vld [vmem:[#allocation36_spill] sm:$0xff] }
 0x448   :  { %3019 = vtanh.f32 %v1120_v3  ;;  %v4216_v3 = vld [vmem:[#allocation12 + $0x28] sm:$0xff] }
 0x455   :  { %v3020_v33 = vpop.eup %3019 }
 0x456   :  { %v1123_v7 = vmul.f32 %v3020_v33, %v1122_v6  ;;  %v4746_v6 = vld [vmem:[#allocation37_spill] sm:$0xff]  ;;  %v4747_v33 = vld [vmem:[#allocation38_spill] sm:$0xff] }
 0x458   :  { %v4126_v37 = vadd.f32 %v1124_v21, %v1123_v7  ;;  %v4748_v7 = vld [vmem:[#allocation39_spill] sm:$0xff]  ;;  %v4749_v21 = vld [vmem:[#allocation40_spill] sm:$0xff] }
 0x45a   :  { %1127 = vst [vmem:[#allocation14 + $0x18] sm:$0xff] %v4126_v37  ;;  %2720 = vmatmul.mubr.f32.vlgmr.msra.gmra.mxu0 %v4126_v37  ;;  %1263 = vmatmul.mubr.f32.vlgmr.msra.gmra.mxu1 %v4126_v37 }
 0x45b   :  { %2723 = vmatpush3.msra.mxu0 %v4131_v25  ;;  %2754 = vmatprep.mubr.msk.f32.mxu0 %vm3312_vm0, %v4676_v24 }
 0x45c   :  { %2724 = vmatprep.subr.mxu0 %v4676_v24  ;;  %2758 = vmatpush3.msra.mxu1 %v3928_v11 }
 0x45d   :  { %2725 = vmatpush3.msra.mxu0 %v4138_v45  ;;  %2759 = vmatprep.subr.mxu1 %v4676_v24 }
 0x45e   :  { %2726 = vmatprep.subr.mxu0 %v4676_v24  ;;  %2760 = vmatpush3.msra.mxu1 %v3934_v12 }
 0x45f   :  { %2727 = vmatpush3.msra.mxu0 %v4144_v42  ;;  %2761 = vmatprep.subr.mxu1 %v4676_v24 }
 0x460   :  { %2728 = vmatprep.subr.mxu0 %v4676_v24  ;;  %2762 = vmatpush3.msra.mxu1 %v3940_v50 }
 0x461   :  { %2729 = vmatpush3.msra.mxu0 %v4150_v49  ;;  %2763 = vmatprep.subr.mxu1 %v4676_v24 }
 0x462   :  { %2730 = vmatprep.subr.mxu0 %v4676_v24  ;;  %2764 = vmatpush3.msra.mxu1 %v3946_v51 }
 0x463   :  { %2731 = vmatpush3.msra.mxu0 %v4156_v22  ;;  %2765 = vmatprep.subr.mxu1 %v4676_v24 }
 0x464   :  { %2732 = vmatprep.subr.mxu0 %v4676_v24  ;;  %2766 = vmatpush3.msra.mxu1 %v3952_v52 }
 0x465   :  { %2733 = vmatpush3.msra.mxu0 %v4162_v40  ;;  %2767 = vmatprep.subr.mxu1 %v4676_v24 }
 0x466   :  { %2734 = vmatprep.subr.mxu0 %v4676_v24  ;;  %2768 = vmatpush3.msra.mxu1 %v3958_v53 }
 0x467   :  { %2735 = vmatpush3.msra.mxu0 %v4168_v39  ;;  %2769 = vmatprep.subr.mxu1 %v4676_v24 }
 0x468   :  { %2736 = vmatprep.subr.mxu0 %v4676_v24  ;;  %2770 = vmatpush3.msra.mxu1 %v3964_v54 }
 0x469   :  { %2737 = vmatpush3.msra.mxu0 %v4174_v8  ;;  %2771 = vmatprep.subr.mxu1 %v4676_v24 }
 0x46a   :  { %2738 = vmatprep.subr.mxu0 %v4676_v24  ;;  %2772 = vmatpush3.msra.mxu1 %v3970_v55 }
 0x46b   :  { %2739 = vmatpush3.msra.mxu0 %v4180_v9  ;;  %2773 = vmatprep.subr.mxu1 %v4676_v24 }
 0x46c   :  { %2740 = vmatprep.subr.mxu0 %v4676_v24  ;;  %2774 = vmatpush3.msra.mxu1 %v3976_v56 }
 0x46d   :  { %2741 = vmatpush3.msra.mxu0 %v4186_v10  ;;  %2775 = vmatprep.subr.mxu1 %v4676_v24 }
 0x46e   :  { %2742 = vmatprep.subr.mxu0 %v4676_v24  ;;  %2776 = vmatpush3.msra.mxu1 %v3982_v57 }
 0x46f   :  { %2743 = vmatpush3.msra.mxu0 %v4192_v41  ;;  %2777 = vmatprep.subr.mxu1 %v4676_v24 }
 0x470   :  { %2744 = vmatprep.subr.mxu0 %v4676_v24  ;;  %2778 = vmatpush3.msra.mxu1 %v3988_v58 }
 0x471   :  { %2745 = vmatpush3.msra.mxu0 %v4198_v1  ;;  %2779 = vmatprep.subr.mxu1 %v4676_v24 }
 0x472   :  { %2746 = vmatprep.subr.mxu0 %v4676_v24  ;;  %2780 = vmatpush3.msra.mxu1 %v3994_v59 }
 0x473   :  { %2747 = vmatpush3.msra.mxu0 %v4204_v4  ;;  %2781 = vmatprep.subr.mxu1 %v4676_v24 }
 0x474   :  { %2748 = vmatprep.subr.mxu0 %v4676_v24  ;;  %2782 = vmatpush3.msra.mxu1 %v4000_v27 }
 0x475   :  { %2749 = vmatpush3.msra.mxu0 %v4210_v2  ;;  %2783 = vmatprep.subr.mxu1 %v4676_v24 }
 0x476   :  { %2750 = vmatprep.subr.mxu0 %v4676_v24  ;;  %2784 = vmatpush3.msra.mxu1 %v4006_v34 }
 0x477   :  { %2751 = vmatpush3.msra.mxu0 %v4216_v3  ;;  %2785 = vmatprep.subr.mxu1 %v4676_v24 }
 0x478   :  { %2752 = vmatprep.subr.mxu0 %v4676_v24  ;;  %2786 = vmatpush3.msra.mxu1 %v4012_v62 }
 0x479   :  { %2753 = vmatpush3.msra.mxu0 %v4222_v46  ;;  %2787 = vmatprep.subr.mxu1 %v4676_v24 }
 0x47a   :  { %2755 = vmatmul.mubr.f32.vlgmr.msra.gmra.mxu0 %v4126_v37  ;;  %1436 = vmatprep.subr.mxu0 %v4018_v63  ;;  %v4750_v37 = vld [vmem:[#allocation41_spill] sm:$0xff] }
 0x47b   :  { %1437 = vmatpush1.msra.mxu0 %v4021_v13  ;;  %2788 = vmatpush3.msra.mxu1 %v4024_v60 }
 0x47c   :  { %1438 = vmatprep.subr.mxu0 %v4027_v14  ;;  %2789 = vmatprep.mubr.msk.f32.mxu1 %vm3312_vm0, %v4676_v24 }
 0x47d   :  { %1439 = vmatpush1.msra.mxu0 %v4032_v61  ;;  %1500 = vmatprep.mubr.f32.mxu0 %v4676_v24 }
 0x47e   :  { %1440 = vmatprep.subr.mxu0 %v4036_v15  ;;  %2792 = vmatprep.subr.mxu1 %v4676_v24 }
 0x47f   :  { %1441 = vmatpush1.msra.mxu0 %v4040_v16 }
 0x480   :  { %1442 = vmatprep.subr.mxu0 %v4043_v17 }
 0x481   :  { %1443 = vmatpush1.msra.mxu0 %v4046_v18 }
 0x482   :  { %1444 = vmatprep.subr.mxu0 %v4049_v19 }
 0x483   :  { %1445 = vmatpush1.msra.mxu0 %v4052_v20 }
 0x484   :  { %1446 = vmatprep.subr.mxu0 %v4055_v23 }
 0x485   :  { %1447 = vmatpush1.msra.mxu0 %v4058_v26 }
 0x486   :  { %1448 = vmatprep.subr.mxu0 %v4061_v29 }
 0x487   :  { %1449 = vmatpush1.msra.mxu0 %v4064_v32 }
 0x488   :  { %1450 = vmatprep.subr.mxu0 %v4067_v35 }
 0x489   :  { %1451 = vmatpush1.msra.mxu0 %v4070_v38 }
 0x48a   :  { %1452 = vmatprep.subr.mxu0 %v4073_v44 }
 0x48b   :  { %1453 = vmatpush1.msra.mxu0 %v4076_v47 }
 0x48c   :  { %1454 = vmatprep.subr.mxu0 %v4079_v43 }
 0x48d   :  { %1455 = vmatpush1.msra.mxu0 %v4082_v0 }
 0x48e   :  { %1456 = vmatprep.subr.mxu0 %v4085_v30  ;;  %v4751_v30 = vld [vmem:[#allocation42_spill] sm:$0xff] }
 0x48f   :  { %1457 = vmatpush1.msra.mxu0 %v4088_v48  ;;  %v1340_v48 = vld [vmem:[#allocation3 + $0x60] sm:$0xff] }
 0x490   :  { %1458 = vmatprep.subr.mxu0 %v4091_v31 }
 0x491   :  { %1459 = vmatpush1.msra.mxu0 %v4094_v28 }
 0x492   :  { %1460 = vmatprep.subr.mxu0 %v4097_v36  ;;  %v4265_v36 = vld [vmem:[#allocation9] sm:$0xff] }
 0x493   :  { %1461 = vmatpush1.msra.mxu0 %v4745_v5  ;;  %4752 = vst [vmem:[#allocation43_spill] sm:$0xff] %v4265_v36 }
 0x494   :  { %1462 = vmatprep.subr.mxu0 %v4746_v6 }
 0x495   :  { %1463 = vmatpush1.msra.mxu0 %v4747_v33 }
 0x496   :  { %1464 = vmatprep.subr.mxu0 %v4748_v7  ;;  %v4268_v7 = vld [vmem:[#allocation9 + $0x8] sm:$0xff] }
 0x497   :  { %1465 = vmatpush1.msra.mxu0 %v4749_v21  ;;  %4753 = vst [vmem:[#allocation44_spill] sm:$0xff] %v4268_v7 }
 0x498   :  { %1466 = vmatprep.subr.mxu0 %v4750_v37  ;;  %v1341_v37 = vld [vmem:[#allocation3 + $0x68] sm:$0xff] }
 0x499   :  { %1467 = vmatpush1.msra.mxu0 %v4751_v30 }
 0x49a   :  { %2827 = vmatprep.subr.mxu0 %v4676_v24 }
 0x51a   :  { %v1194_v31 = vpop.f32.mrf.mxu0  ;;  %v1264_v28 = vpop.f32.mrf.mxu1 }
 0x51b   :  { %v1265_v5 = vadd.f32 %v4265_v36, %v1264_v28 }
 0x51c   :  { %v2721_v6 = vpop.f32.mrf.mxu0  ;;  %v1266_v0 = vpop.f32.mrf.mxu1 }
 0x51d   :  { %v1343_v33 = vadd.f32 %v1340_v48, %v1265_v5  ;;  %v1267_v21 = vadd.f32 %v4268_v7, %v1266_v0  ;;  %v4271_v6 = vld [vmem:[#allocation9 + $0x10] sm:$0xff] }
 0x51f   :  { %v2127_v43 = vmul.f32 -1.442695, %v1343_v33  ;;  %v1350_v30 = vadd.f32 %v1341_v37, %v1267_v21  ;;  %v1342_v33 = vld [vmem:[#allocation3 + $0x70] sm:$0xff] }
 0x521   :  { %3021 = vpow2.f32 %v2127_v43  ;;  %v2128_v47 = vmul.f32 -1.442695, %v1350_v30  ;;  %v4274_v30 = vld [vmem:[#allocation8] sm:$0xff] }
 0x523   :  { %3023 = vpow2.f32 %v2128_v47 }
 0x52e   :  { %v3022_v44 = vpop.eup %3021 }
 0x52f   :  { %v1347_v38 = vadd.f32 1.0, %v3022_v44  ;;  %v1195_v44 = vadd.f32 %v4274_v30, %v1194_v31  ;;  %v4756_v31 = vld [vmem:[#allocation25_spill] sm:$0xff] }
 0x530   :  { %v3024_v35 = vpop.eup %3023 }
 0x531   :  { %3025 = vrcp.f32 %v1347_v38  ;;  %v1354_v29 = vadd.f32 1.0, %v3024_v35 }
 0x533   :  { %3027 = vrcp.f32 %v1354_v29  ;;  %v4754_v29 = vld [vmem:[#allocation23_spill] sm:$0xff] }
 0x53a   :  { %v1335_v32 = vpop.f32.mrf.mxu0 }
 0x53b   :  { %v1336_v48 = vadd.f32 %v4271_v6, %v1335_v32  ;;  %v4755_v32 = vld [vmem:[#allocation24_spill] sm:$0xff] }
 0x53c   :  { %v2756_v28 = vpop.f32.mrf.mxu0 }
 0x53d   :  { %v4758_v28 = vld [vmem:[#allocation27_spill] sm:$0xff] }
 0x53e   :  { %v3026_v5 = vpop.eup %3025 }
 0x53f   :  { %v1357_v0 = vmul.f32 %v3026_v5, %v1336_v48  ;;  %v4759_v48 = vld [vmem:[#allocation28_spill] sm:$0xff]  ;;  %v4760_v5 = vld [vmem:[#allocation29_spill] sm:$0xff] }
 0x540   :  { %v3028_v43 = vpop.eup %3027 }
 0x541   :  { %v1358_v7 = vadd.f32 %v1357_v0, %v1342_v33  ;;  %v1360_v38 = vsub.f32 1.0, %v3028_v43  ;;  %v1362_v35 = vmul.f32 %v3028_v43, %v1195_v44  ;;  %v4761_v33 = vld [vmem:[#allocation30_spill] sm:$0xff]  ;;  %v4762_v0 = vld [vmem:[#allocation31_spill] sm:$0xff]  ;;  %v4763_v43 = vld [vmem:[#allocation32_spill] sm:$0xff] }
 0x542   :  { %v4764_v44 = vld [vmem:[#allocation33_spill] sm:$0xff] }
 0x543   :  { %3029 = vtanh.f32 %v1358_v7  ;;  %v4757_v7 = vld [vmem:[#allocation26_spill] sm:$0xff] }
 0x550   :  { %v3030_v47 = vpop.eup %3029 }
 0x551   :  { %v1361_v21 = vmul.f32 %v3030_v47, %v1360_v38  ;;  %v4765_v38 = vld [vmem:[#allocation34_spill] sm:$0xff]  ;;  %v4766_v47 = vld [vmem:[#allocation35_spill] sm:$0xff] }
 0x553   :  { %v4277_v37 = vadd.f32 %v1362_v35, %v1361_v21  ;;  %v4767_v21 = vld [vmem:[#allocation36_spill] sm:$0xff]  ;;  %v4768_v35 = vld [vmem:[#allocation37_spill] sm:$0xff] }
 0x555   :  { %1365 = vst [vmem:[#allocation14 + $0x20] sm:$0xff] %v4277_v37  ;;  %2790 = vmatmul.mubr.f32.vlgmr.msra.gmra.mxu1 %v4277_v37  ;;  %1501 = vmatmul.mubr.f32.vlgmr.msra.gmra.mxu0 %v4277_v37 }
 0x556   :  { %2793 = vmatpush3.msra.mxu1 %v4131_v25  ;;  %2824 = vmatprep.mubr.msk.f32.mxu1 %vm3312_vm0, %v4676_v24 }
 0x557   :  { %2794 = vmatprep.subr.mxu1 %v4676_v24  ;;  %2828 = vmatpush3.msra.mxu0 %v3928_v11 }
 0x558   :  { %2795 = vmatpush3.msra.mxu1 %v4138_v45  ;;  %2829 = vmatprep.subr.mxu0 %v4676_v24 }
 0x559   :  { %2796 = vmatprep.subr.mxu1 %v4676_v24  ;;  %2830 = vmatpush3.msra.mxu0 %v3934_v12 }
 0x55a   :  { %2797 = vmatpush3.msra.mxu1 %v4144_v42  ;;  %2831 = vmatprep.subr.mxu0 %v4676_v24 }
 0x55b   :  { %2798 = vmatprep.subr.mxu1 %v4676_v24  ;;  %2832 = vmatpush3.msra.mxu0 %v3940_v50 }
 0x55c   :  { %2799 = vmatpush3.msra.mxu1 %v4150_v49  ;;  %2833 = vmatprep.subr.mxu0 %v4676_v24 }
 0x55d   :  { %2800 = vmatprep.subr.mxu1 %v4676_v24  ;;  %2834 = vmatpush3.msra.mxu0 %v3946_v51 }
 0x55e   :  { %2801 = vmatpush3.msra.mxu1 %v4156_v22  ;;  %2835 = vmatprep.subr.mxu0 %v4676_v24 }
 0x55f   :  { %2802 = vmatprep.subr.mxu1 %v4676_v24  ;;  %2836 = vmatpush3.msra.mxu0 %v3952_v52 }
 0x560   :  { %2803 = vmatpush3.msra.mxu1 %v4162_v40  ;;  %2837 = vmatprep.subr.mxu0 %v4676_v24 }
 0x561   :  { %2804 = vmatprep.subr.mxu1 %v4676_v24  ;;  %2838 = vmatpush3.msra.mxu0 %v3958_v53 }
 0x562   :  { %2805 = vmatpush3.msra.mxu1 %v4168_v39  ;;  %2839 = vmatprep.subr.mxu0 %v4676_v24 }
 0x563   :  { %2806 = vmatprep.subr.mxu1 %v4676_v24  ;;  %2840 = vmatpush3.msra.mxu0 %v3964_v54 }
 0x564   :  { %2807 = vmatpush3.msra.mxu1 %v4174_v8  ;;  %2841 = vmatprep.subr.mxu0 %v4676_v24 }
 0x565   :  { %2808 = vmatprep.subr.mxu1 %v4676_v24  ;;  %2842 = vmatpush3.msra.mxu0 %v3970_v55 }
 0x566   :  { %2809 = vmatpush3.msra.mxu1 %v4180_v9  ;;  %2843 = vmatprep.subr.mxu0 %v4676_v24 }
 0x567   :  { %2810 = vmatprep.subr.mxu1 %v4676_v24  ;;  %2844 = vmatpush3.msra.mxu0 %v3976_v56 }
 0x568   :  { %2811 = vmatpush3.msra.mxu1 %v4186_v10  ;;  %2845 = vmatprep.subr.mxu0 %v4676_v24 }
 0x569   :  { %2812 = vmatprep.subr.mxu1 %v4676_v24  ;;  %2846 = vmatpush3.msra.mxu0 %v3982_v57 }
 0x56a   :  { %2813 = vmatpush3.msra.mxu1 %v4192_v41  ;;  %2847 = vmatprep.subr.mxu0 %v4676_v24 }
 0x56b   :  { %2814 = vmatprep.subr.mxu1 %v4676_v24  ;;  %2848 = vmatpush3.msra.mxu0 %v3988_v58 }
 0x56c   :  { %2815 = vmatpush3.msra.mxu1 %v4198_v1  ;;  %2849 = vmatprep.subr.mxu0 %v4676_v24 }
 0x56d   :  { %2816 = vmatprep.subr.mxu1 %v4676_v24  ;;  %2850 = vmatpush3.msra.mxu0 %v3994_v59 }
 0x56e   :  { %2817 = vmatpush3.msra.mxu1 %v4204_v4  ;;  %2851 = vmatprep.subr.mxu0 %v4676_v24 }
 0x56f   :  { %2818 = vmatprep.subr.mxu1 %v4676_v24  ;;  %2852 = vmatpush3.msra.mxu0 %v4000_v27 }
 0x570   :  { %2819 = vmatpush3.msra.mxu1 %v4210_v2  ;;  %2853 = vmatprep.subr.mxu0 %v4676_v24 }
 0x571   :  { %2820 = vmatprep.subr.mxu1 %v4676_v24  ;;  %2854 = vmatpush3.msra.mxu0 %v4006_v34 }
 0x572   :  { %2821 = vmatpush3.msra.mxu1 %v4216_v3  ;;  %2855 = vmatprep.subr.mxu0 %v4676_v24 }
 0x573   :  { %2822 = vmatprep.subr.mxu1 %v4676_v24  ;;  %2856 = vmatpush3.msra.mxu0 %v4012_v62 }
 0x574   :  { %2823 = vmatpush3.msra.mxu1 %v4222_v46  ;;  %2857 = vmatprep.subr.mxu0 %v4676_v24 }
 0x575   :  { %2825 = vmatmul.mubr.f32.vlgmr.msra.gmra.mxu1 %v4277_v37  ;;  %1674 = vmatprep.subr.mxu1 %v4018_v63  ;;  %v4769_v37 = vld [vmem:[#allocation38_spill] sm:$0xff] }
 0x576   :  { %1675 = vmatpush1.msra.mxu1 %v4021_v13  ;;  %2858 = vmatpush3.msra.mxu0 %v4024_v60 }
 0x577   :  { %1676 = vmatprep.subr.mxu1 %v4027_v14  ;;  %2859 = vmatprep.mubr.msk.f32.mxu0 %vm3312_vm0, %v4676_v24 }
 0x578   :  { %1677 = vmatpush1.msra.mxu1 %v4032_v61  ;;  %1738 = vmatprep.mubr.f32.mxu1 %v4676_v24 }
 0x579   :  { %1678 = vmatprep.subr.mxu1 %v4036_v15  ;;  %2862 = vmatprep.subr.mxu0 %v4676_v24 }
 0x57a   :  { %1679 = vmatpush1.msra.mxu1 %v4040_v16 }
 0x57b   :  { %1680 = vmatprep.subr.mxu1 %v4043_v17 }
 0x57c   :  { %1681 = vmatpush1.msra.mxu1 %v4046_v18 }
 0x57d   :  { %1682 = vmatprep.subr.mxu1 %v4049_v19 }
 0x57e   :  { %1683 = vmatpush1.msra.mxu1 %v4052_v20 }
 0x57f   :  { %1684 = vmatprep.subr.mxu1 %v4055_v23 }
 0x580   :  { %1685 = vmatpush1.msra.mxu1 %v4058_v26 }
 0x581   :  { %1686 = vmatprep.subr.mxu1 %v4754_v29 }
 0x582   :  { %1687 = vmatpush1.msra.mxu1 %v4755_v32 }
 0x583   :  { %1688 = vmatprep.subr.mxu1 %v4756_v31 }
 0x584   :  { %1689 = vmatpush1.msra.mxu1 %v4757_v7 }
 0x585   :  { %1690 = vmatprep.subr.mxu1 %v4758_v28 }
 0x586   :  { %1691 = vmatpush1.msra.mxu1 %v4759_v48  ;;  %v4770_v48 = vld [vmem:[#allocation39_spill] sm:$0xff] }
 0x587   :  { %1692 = vmatprep.subr.mxu1 %v4760_v5  ;;  %v4771_v5 = vld [vmem:[#allocation40_spill] sm:$0xff] }
 0x588   :  { %1693 = vmatpush1.msra.mxu1 %v4761_v33  ;;  %v4772_v33 = vld [vmem:[#allocation41_spill] sm:$0xff] }
 0x589   :  { %1694 = vmatprep.subr.mxu1 %v4762_v0  ;;  %v4773_v0 = vld [vmem:[#allocation42_spill] sm:$0xff] }
 0x58a   :  { %1695 = vmatpush1.msra.mxu1 %v4763_v43  ;;  %v1578_v43 = vld [vmem:[#allocation3 + $0x78] sm:$0xff] }
 0x58b   :  { %1696 = vmatprep.subr.mxu1 %v4764_v44 }
 0x58c   :  { %1697 = vmatpush1.msra.mxu1 %v4765_v38 }
 0x58d   :  { %1698 = vmatprep.subr.mxu1 %v4766_v47 }
 0x58e   :  { %1699 = vmatpush1.msra.mxu1 %v4767_v21 }
 0x58f   :  { %1700 = vmatprep.subr.mxu1 %v4768_v35 }
 0x590   :  { %1701 = vmatpush1.msra.mxu1 %v4769_v37  ;;  %v4774_v37 = vld [vmem:[#allocation44_spill] sm:$0xff] }
 0x591   :  { %1702 = vmatprep.subr.mxu1 %v4770_v48  ;;  %v1579_v48 = vld [vmem:[#allocation3 + $0x80] sm:$0xff] }
 0x592   :  { %1703 = vmatpush1.msra.mxu1 %v4771_v5 }
 0x593   :  { %1704 = vmatprep.subr.mxu1 %v4772_v33 }
 0x594   :  { %1705 = vmatpush1.msra.mxu1 %v4773_v0 }
 0x595   :  { %2897 = vmatprep.subr.mxu1 %v4676_v24 }
 0x615   :  { %v1432_v44 = vpop.f32.mrf.mxu1  ;;  %v1502_v38 = vpop.f32.mrf.mxu0 }
 0x616   :  { %v1503_v47 = vadd.f32 %v4265_v36, %v1502_v38  ;;  %v1580_v36 = vld [vmem:[#allocation3 + $0x88] sm:$0xff] }
 0x617   :  { %v2791_v21 = vpop.f32.mrf.mxu1  ;;  %v1504_v28 = vpop.f32.mrf.mxu0 }
 0x618   :  { %v1581_v35 = vadd.f32 %v1578_v43, %v1503_v47  ;;  %v1505_v31 = vadd.f32 %v4774_v37, %v1504_v28 }
 0x61a   :  { %v2129_v7 = vmul.f32 -1.442695, %v1581_v35  ;;  %v1588_v5 = vadd.f32 %v1579_v48, %v1505_v31  ;;  %v1433_v31 = vadd.f32 %v4274_v30, %v1432_v44 }
 0x61c   :  { %3031 = vpow2.f32 %v2129_v7  ;;  %v2130_v32 = vmul.f32 -1.442695, %v1588_v5 }
 0x61e   :  { %3033 = vpow2.f32 %v2130_v32 }
 0x629   :  { %v3032_v33 = vpop.eup %3031 }
 0x62a   :  { %v1585_v0 = vadd.f32 1.0, %v3032_v33 }
 0x62b   :  { %v3034_v29 = vpop.eup %3033 }
 0x62c   :  { %3035 = vrcp.f32 %v1585_v0  ;;  %v1592_v23 = vadd.f32 1.0, %v3034_v29 }
 0x62e   :  { %3037 = vrcp.f32 %v1592_v23  ;;  %v4798_v23 = vld [vmem:[#allocation43_spill] sm:$0xff] }
 0x635   :  { %v1573_v26 = vpop.f32.mrf.mxu1 }
 0x636   :  { %v1574_v38 = vadd.f32 %v4271_v6, %v1573_v26 }
 0x637   :  { %v2826_v20 = vpop.f32.mrf.mxu1 }
 0x638   :  { %v1816_v20 = vld [vmem:[#allocation3 + $0x90] sm:$0xff] }
 0x639   :  { %v3036_v21 = vpop.eup %3035 }
 0x63a   :  { %v1595_v43 = vmul.f32 %v3036_v21, %v1574_v38  ;;  %v1817_v38 = vld [vmem:[#allocation3 + $0x98] sm:$0xff] }
 0x63b   :  { %v3038_v28 = vpop.eup %3037 }
 0x63c   :  { %v1596_v47 = vadd.f32 %v1595_v43, %v1580_v36  ;;  %v1598_v7 = vsub.f32 1.0, %v3038_v28  ;;  %v1600_v5 = vmul.f32 %v3038_v28, %v1433_v31 }
 0x63e   :  { %3039 = vtanh.f32 %v1596_v47 }
 0x64b   :  { %v3040_v32 = vpop.eup %3039 }
 0x64c   :  { %v1599_v48 = vmul.f32 %v3040_v32, %v1598_v7 }
 0x64e   :  { %v4388_v33 = vadd.f32 %v1600_v5, %v1599_v48 }
 0x650   :  { %1603 = vst [vmem:[#allocation14 + $0x28] sm:$0xff] %v4388_v33  ;;  %2860 = vmatmul.mubr.f32.vlgmr.msra.gmra.mxu0 %v4388_v33  ;;  %1739 = vmatmul.mubr.f32.vlgmr.msra.gmra.mxu1 %v4388_v33 }
 0x651   :  { %2863 = vmatpush3.msra.mxu0 %v4131_v25  ;;  %2894 = vmatprep.mubr.msk.f32.mxu0 %vm3312_vm0, %v4676_v24 }
 0x652   :  { %2864 = vmatprep.subr.mxu0 %v4676_v24  ;;  %2898 = vmatpush3.msra.mxu1 %v3928_v11  ;;  %v4775_v11 = vld [vmem:[#allocation46_spill] sm:$0xff] }
 0x653   :  { %2865 = vmatpush3.msra.mxu0 %v4138_v45  ;;  %2899 = vmatprep.subr.mxu1 %v4676_v24 }
 0x654   :  { %2866 = vmatprep.subr.mxu0 %v4676_v24  ;;  %2900 = vmatpush3.msra.mxu1 %v3934_v12  ;;  %v4776_v12 = vld [vmem:[#allocation47_spill] sm:$0xff] }
 0x655   :  { %2867 = vmatpush3.msra.mxu0 %v4144_v42  ;;  %2901 = vmatprep.subr.mxu1 %v4676_v24 }
 0x656   :  { %2868 = vmatprep.subr.mxu0 %v4676_v24  ;;  %2902 = vmatpush3.msra.mxu1 %v3940_v50  ;;  %v4777_v50 = vld [vmem:[#allocation49_spill] sm:$0xff] }
 0x657   :  { %2869 = vmatpush3.msra.mxu0 %v4150_v49  ;;  %2903 = vmatprep.subr.mxu1 %v4676_v24 }
 0x658   :  { %2870 = vmatprep.subr.mxu0 %v4676_v24  ;;  %2904 = vmatpush3.msra.mxu1 %v3946_v51  ;;  %v4778_v51 = vld [vmem:[#allocation23_spill] sm:$0xff] }
 0x659   :  { %2871 = vmatpush3.msra.mxu0 %v4156_v22  ;;  %2905 = vmatprep.subr.mxu1 %v4676_v24 }
 0x65a   :  { %2872 = vmatprep.subr.mxu0 %v4676_v24  ;;  %2906 = vmatpush3.msra.mxu1 %v3952_v52  ;;  %v4779_v52 = vld [vmem:[#allocation24_spill] sm:$0xff] }
 0x65b   :  { %2873 = vmatpush3.msra.mxu0 %v4162_v40  ;;  %2907 = vmatprep.subr.mxu1 %v4676_v24 }
 0x65c   :  { %2874 = vmatprep.subr.mxu0 %v4676_v24  ;;  %2908 = vmatpush3.msra.mxu1 %v3958_v53  ;;  %v4780_v53 = vld [vmem:[#allocation25_spill] sm:$0xff] }
 0x65d   :  { %2875 = vmatpush3.msra.mxu0 %v4168_v39  ;;  %2909 = vmatprep.subr.mxu1 %v4676_v24 }
 0x65e   :  { %2876 = vmatprep.subr.mxu0 %v4676_v24  ;;  %2910 = vmatpush3.msra.mxu1 %v3964_v54  ;;  %v4781_v54 = vld [vmem:[#allocation26_spill] sm:$0xff] }
 0x65f   :  { %2877 = vmatpush3.msra.mxu0 %v4174_v8  ;;  %2911 = vmatprep.subr.mxu1 %v4676_v24 }
 0x660   :  { %2878 = vmatprep.subr.mxu0 %v4676_v24  ;;  %2912 = vmatpush3.msra.mxu1 %v3970_v55  ;;  %v4782_v55 = vld [vmem:[#allocation27_spill] sm:$0xff] }
 0x661   :  { %2879 = vmatpush3.msra.mxu0 %v4180_v9  ;;  %2913 = vmatprep.subr.mxu1 %v4676_v24 }
 0x662   :  { %2880 = vmatprep.subr.mxu0 %v4676_v24  ;;  %2914 = vmatpush3.msra.mxu1 %v3976_v56  ;;  %v4783_v56 = vld [vmem:[#allocation28_spill] sm:$0xff] }
 0x663   :  { %2881 = vmatpush3.msra.mxu0 %v4186_v10  ;;  %2915 = vmatprep.subr.mxu1 %v4676_v24 }
 0x664   :  { %2882 = vmatprep.subr.mxu0 %v4676_v24  ;;  %2916 = vmatpush3.msra.mxu1 %v3982_v57  ;;  %v4784_v57 = vld [vmem:[#allocation29_spill] sm:$0xff] }
 0x665   :  { %2883 = vmatpush3.msra.mxu0 %v4192_v41  ;;  %2917 = vmatprep.subr.mxu1 %v4676_v24 }
 0x666   :  { %2884 = vmatprep.subr.mxu0 %v4676_v24  ;;  %2918 = vmatpush3.msra.mxu1 %v3988_v58  ;;  %v4785_v58 = vld [vmem:[#allocation30_spill] sm:$0xff] }
 0x667   :  { %2885 = vmatpush3.msra.mxu0 %v4198_v1  ;;  %2919 = vmatprep.subr.mxu1 %v4676_v24 }
 0x668   :  { %2886 = vmatprep.subr.mxu0 %v4676_v24  ;;  %2920 = vmatpush3.msra.mxu1 %v3994_v59  ;;  %v4786_v59 = vld [vmem:[#allocation31_spill] sm:$0xff] }
 0x669   :  { %2887 = vmatpush3.msra.mxu0 %v4204_v4  ;;  %2921 = vmatprep.subr.mxu1 %v4676_v24 }
 0x66a   :  { %2888 = vmatprep.subr.mxu0 %v4676_v24  ;;  %2922 = vmatpush3.msra.mxu1 %v4000_v27  ;;  %v4787_v27 = vld [vmem:[#allocation32_spill] sm:$0xff] }
 0x66b   :  { %2889 = vmatpush3.msra.mxu0 %v4210_v2  ;;  %2923 = vmatprep.subr.mxu1 %v4676_v24 }
 0x66c   :  { %2890 = vmatprep.subr.mxu0 %v4676_v24  ;;  %2924 = vmatpush3.msra.mxu1 %v4006_v34  ;;  %v4788_v34 = vld [vmem:[#allocation33_spill] sm:$0xff] }
 0x66d   :  { %2891 = vmatpush3.msra.mxu0 %v4216_v3  ;;  %2925 = vmatprep.subr.mxu1 %v4676_v24 }
 0x66e   :  { %2892 = vmatprep.subr.mxu0 %v4676_v24  ;;  %2926 = vmatpush3.msra.mxu1 %v4012_v62  ;;  %v4789_v62 = vld [vmem:[#allocation34_spill] sm:$0xff] }
 0x66f   :  { %2893 = vmatpush3.msra.mxu0 %v4222_v46  ;;  %2927 = vmatprep.subr.mxu1 %v4676_v24 }
 0x670   :  { %2895 = vmatmul.mubr.f32.vlgmr.msra.gmra.mxu0 %v4388_v33  ;;  %1912 = vmatprep.subr.mxu0 %v4018_v63  ;;  %v4790_v63 = vld [vmem:[#allocation35_spill] sm:$0xff] }
 0x671   :  { %1913 = vmatpush1.msra.mxu0 %v4021_v13  ;;  %2928 = vmatpush3.msra.mxu1 %v4024_v60  ;;  %v4791_v13 = vld [vmem:[#allocation36_spill] sm:$0xff]  ;;  %v4792_v60 = vld [vmem:[#allocation37_spill] sm:$0xff] }
 0x672   :  { %1914 = vmatprep.subr.mxu0 %v4027_v14  ;;  %2929 = vmatprep.mubr.msk.f32.mxu1 %vm3312_vm0, %v4676_v24  ;;  %v4793_v14 = vld [vmem:[#allocation38_spill] sm:$0xff] }
 0x673   :  { %1915 = vmatpush1.msra.mxu0 %v4032_v61  ;;  %1976 = vmatprep.mubr.f32.mxu0 %v4676_v24  ;;  %v4794_v61 = vld [vmem:[#allocation39_spill] sm:$0xff] }
 0x674   :  { %1916 = vmatprep.subr.mxu0 %v4036_v15  ;;  %2932 = vmatprep.subr.mxu1 %v4676_v24  ;;  %v4795_v15 = vld [vmem:[#allocation40_spill] sm:$0xff] }
 0x675   :  { %1917 = vmatpush1.msra.mxu0 %v4040_v16  ;;  %v4796_v16 = vld [vmem:[#allocation41_spill] sm:$0xff] }
 0x676   :  { %1918 = vmatprep.subr.mxu0 %v4043_v17  ;;  %v4797_v17 = vld [vmem:[#allocation42_spill] sm:$0xff] }
 0x677   :  { %1919 = vmatpush1.msra.mxu0 %v4046_v18 }
 0x678   :  { %1920 = vmatprep.subr.mxu0 %v4049_v19 }
 0x679   :  { %1921 = vmatpush1.msra.mxu0 %v4775_v11  ;;  %v1818_v11 = vld [vmem:[#allocation3 + $0xa0] sm:$0xff] }
 0x67a   :  { %1922 = vmatprep.subr.mxu0 %v4776_v12 }
 0x67b   :  { %1923 = vmatpush1.msra.mxu0 %v4777_v50 }
 0x67c   :  { %1924 = vmatprep.subr.mxu0 %v4778_v51 }
 0x67d   :  { %1925 = vmatpush1.msra.mxu0 %v4779_v52 }
 0x67e   :  { %1926 = vmatprep.subr.mxu0 %v4780_v53 }
 0x67f   :  { %1927 = vmatpush1.msra.mxu0 %v4781_v54 }
 0x680   :  { %1928 = vmatprep.subr.mxu0 %v4782_v55 }
 0x681   :  { %1929 = vmatpush1.msra.mxu0 %v4783_v56 }
 0x682   :  { %1930 = vmatprep.subr.mxu0 %v4784_v57 }
 0x683   :  { %1931 = vmatpush1.msra.mxu0 %v4785_v58 }
 0x684   :  { %1932 = vmatprep.subr.mxu0 %v4786_v59 }
 0x685   :  { %1933 = vmatpush1.msra.mxu0 %v4787_v27 }
 0x686   :  { %1934 = vmatprep.subr.mxu0 %v4788_v34  ;;  %v2056_v34 = vld [vmem:[#allocation3 + $0xb8] sm:$0xff] }
 0x687   :  { %1935 = vmatpush1.msra.mxu0 %v4789_v62 }
 0x688   :  { %1936 = vmatprep.subr.mxu0 %v4790_v63 }
 0x689   :  { %1937 = vmatpush1.msra.mxu0 %v4791_v13 }
 0x68a   :  { %1938 = vmatprep.subr.mxu0 %v4792_v60 }
 0x68b   :  { %1939 = vmatpush1.msra.mxu0 %v4793_v14 }
 0x68c   :  { %1940 = vmatprep.subr.mxu0 %v4794_v61 }
 0x68d   :  { %1941 = vmatpush1.msra.mxu0 %v4795_v15 }
 0x68e   :  { %1942 = vmatprep.subr.mxu0 %v4796_v16 }
 0x68f   :  { %1943 = vmatpush1.msra.mxu0 %v4797_v17 }
 0x710   :  { %v1670_v18 = vpop.f32.mrf.mxu0  ;;  %v1740_v19 = vpop.f32.mrf.mxu1 }
 0x711   :  { %v1741_v26 = vadd.f32 %v4798_v23, %v1740_v19  ;;  %v1671_v52 = vadd.f32 %v4274_v30, %v1670_v18 }
 0x712   :  { %v2861_v36 = vpop.f32.mrf.mxu0  ;;  %v1742_v29 = vpop.f32.mrf.mxu1 }
 0x713   :  { %v1819_v0 = vadd.f32 %v1816_v20, %v1741_v26  ;;  %v1743_v35 = vadd.f32 %v4774_v37, %v1742_v29 }
 0x715   :  { %v2131_v44 = vmul.f32 -1.442695, %v1819_v0  ;;  %v1826_v21 = vadd.f32 %v1817_v38, %v1743_v35 }
 0x717   :  { %3041 = vpow2.f32 %v2131_v44  ;;  %v2132_v43 = vmul.f32 -1.442695, %v1826_v21 }
 0x719   :  { %3043 = vpow2.f32 %v2132_v43 }
 0x724   :  { %v3042_v47 = vpop.eup %3041 }
 0x725   :  { %v1823_v28 = vadd.f32 1.0, %v3042_v47 }
 0x726   :  { %v3044_v31 = vpop.eup %3043 }
 0x727   :  { %3045 = vrcp.f32 %v1823_v28  ;;  %v1830_v32 = vadd.f32 1.0, %v3044_v31 }
 0x729   :  { %3047 = vrcp.f32 %v1830_v32 }
 0x730   :  { %v1811_v7 = vpop.f32.mrf.mxu0 }
 0x731   :  { %v1812_v5 = vadd.f32 %v4271_v6, %v1811_v7 }
 0x732   :  { %v2896_v48 = vpop.f32.mrf.mxu0 }
 0x734   :  { %v3046_v33 = vpop.eup %3045 }
 0x735   :  { %v1833_v12 = vmul.f32 %v3046_v33, %v1812_v5 }
 0x736   :  { %v3048_v51 = vpop.eup %3047 }
 0x737   :  { %v1834_v50 = vadd.f32 %v1833_v12, %v1818_v11  ;;  %v1836_v53 = vsub.f32 1.0, %v3048_v51  ;;  %v1838_v56 = vmul.f32 %v3048_v51, %v1671_v52 }
 0x739   :  { %3049 = vtanh.f32 %v1834_v50 }
 0x746   :  { %v3050_v54 = vpop.eup %3049 }
 0x747   :  { %v1837_v55 = vmul.f32 %v3050_v54, %v1836_v53 }
 0x749   :  { %v1839_v57 = vadd.f32 %v1838_v56, %v1837_v55 }
 0x74b   :  { %1841 = vst [vmem:[#allocation14 + $0x30] sm:$0xff] %v1839_v57  ;;  %2930 = vmatmul.mubr.f32.vlgmr.msra.gmra.mxu1 %v1839_v57  ;;  %1977 = vmatmul.mubr.f32.vlgmr.msra.gmra.mxu0 %v1839_v57 }
 0x74c   :  { %2933 = vmatpush3.msra.mxu1 %v4131_v25  ;;  %2964 = vmatprep.mubr.msk.f32.mxu1 %vm3312_vm0, %v4676_v24 }
 0x74d   :  { %2934 = vmatprep.subr.mxu1 %v4676_v24 }
 0x74e   :  { %2935 = vmatpush3.msra.mxu1 %v4138_v45 }
 0x74f   :  { %2936 = vmatprep.subr.mxu1 %v4676_v24 }
 0x750   :  { %2937 = vmatpush3.msra.mxu1 %v4144_v42  ;;  %v2054_v42 = vld [vmem:[#allocation3 + $0xa8] sm:$0xff] }
 0x751   :  { %2938 = vmatprep.subr.mxu1 %v4676_v24 }
 0x752   :  { %2939 = vmatpush3.msra.mxu1 %v4150_v49 }
 0x753   :  { %2940 = vmatprep.subr.mxu1 %v4676_v24 }
 0x754   :  { %2941 = vmatpush3.msra.mxu1 %v4156_v22 }
 0x755   :  { %2942 = vmatprep.subr.mxu1 %v4676_v24 }
 0x756   :  { %2943 = vmatpush3.msra.mxu1 %v4162_v40 }
 0x757   :  { %2944 = vmatprep.subr.mxu1 %v4676_v24 }
 0x758   :  { %2945 = vmatpush3.msra.mxu1 %v4168_v39 }
 0x759   :  { %2946 = vmatprep.subr.mxu1 %v4676_v24 }
 0x75a   :  { %2947 = vmatpush3.msra.mxu1 %v4174_v8 }
 0x75b   :  { %2948 = vmatprep.subr.mxu1 %v4676_v24 }
 0x75c   :  { %2949 = vmatpush3.msra.mxu1 %v4180_v9 }
 0x75d   :  { %2950 = vmatprep.subr.mxu1 %v4676_v24 }
 0x75e   :  { %2951 = vmatpush3.msra.mxu1 %v4186_v10  ;;  %v2055_v10 = vld [vmem:[#allocation3 + $0xb0] sm:$0xff] }
 0x75f   :  { %2952 = vmatprep.subr.mxu1 %v4676_v24 }
 0x760   :  { %2953 = vmatpush3.msra.mxu1 %v4192_v41 }
 0x761   :  { %2954 = vmatprep.subr.mxu1 %v4676_v24 }
 0x762   :  { %2955 = vmatpush3.msra.mxu1 %v4198_v1 }
 0x763   :  { %2956 = vmatprep.subr.mxu1 %v4676_v24 }
 0x764   :  { %2957 = vmatpush3.msra.mxu1 %v4204_v4 }
 0x765   :  { %2958 = vmatprep.subr.mxu1 %v4676_v24 }
 0x766   :  { %2959 = vmatpush3.msra.mxu1 %v4210_v2 }
 0x767   :  { %2960 = vmatprep.subr.mxu1 %v4676_v24 }
 0x768   :  { %2961 = vmatpush3.msra.mxu1 %v4216_v3 }
 0x769   :  { %2962 = vmatprep.subr.mxu1 %v4676_v24 }
 0x76a   :  { %2963 = vmatpush3.msra.mxu1 %v4222_v46 }
 0x76b   :  { %2965 = vmatmul.mubr.f32.vlgmr.msra.gmra.mxu1 %v1839_v57 }
 0x80b   :  { %v1908_v25 = vpop.f32.mrf.mxu1  ;;  %v1978_v45 = vpop.f32.mrf.mxu0 }
 0x80c   :  { %v1979_v49 = vadd.f32 %v4798_v23, %v1978_v45  ;;  %v1909_v13 = vadd.f32 %v4274_v30, %v1908_v25 }
 0x80d   :  { %v2931_v22 = vpop.f32.mrf.mxu1  ;;  %v1980_v40 = vpop.f32.mrf.mxu0 }
 0x80e   :  { %v2057_v39 = vadd.f32 %v2054_v42, %v1979_v49  ;;  %v1981_v9 = vadd.f32 %v4774_v37, %v1980_v40 }
 0x810   :  { %v2133_v8 = vmul.f32 -1.442695, %v2057_v39  ;;  %v2064_v41 = vadd.f32 %v2055_v10, %v1981_v9 }
 0x812   :  { %3051 = vpow2.f32 %v2133_v8  ;;  %v2134_v1 = vmul.f32 -1.442695, %v2064_v41 }
 0x814   :  { %3053 = vpow2.f32 %v2134_v1 }
 0x81f   :  { %v3052_v24 = vpop.eup %3051 }
 0x820   :  { %v2061_v4 = vadd.f32 1.0, %v3052_v24 }
 0x821   :  { %v3054_v2 = vpop.eup %3053 }
 0x822   :  { %3055 = vrcp.f32 %v2061_v4  ;;  %v2068_v46 = vadd.f32 1.0, %v3054_v2 }
 0x824   :  { %3057 = vrcp.f32 %v2068_v46 }
 0x82b   :  { %v2049_v3 = vpop.f32.mrf.mxu1 }
 0x82c   :  { %v2050_v59 = vadd.f32 %v4271_v6, %v2049_v3 }
 0x82d   :  { %v2966_v58 = vpop.f32.mrf.mxu1 }
 0x82f   :  { %v3056_v27 = vpop.eup %3055 }
 0x830   :  { %v2071_v62 = vmul.f32 %v3056_v27, %v2050_v59 }
 0x831   :  { %v3058_v37 = vpop.eup %3057 }
 0x832   :  { %v2072_v63 = vadd.f32 %v2071_v62, %v2056_v34  ;;  %v2074_v60 = vsub.f32 1.0, %v3058_v37  ;;  %v2076_v61 = vmul.f32 %v3058_v37, %v1909_v13 }
 0x834   :  { %3059 = vtanh.f32 %v2072_v63 }
 0x841   :  { %v3060_v14 = vpop.eup %3059 }
 0x842   :  { %v2075_v15 = vmul.f32 %v3060_v14, %v2074_v60 }
 0x844   :  { %v2077_v16 = vadd.f32 %v2076_v61, %v2075_v15 }
 0x846   :  { %2079 = vst [vmem:[#allocation14 + $0x38] sm:$0xff] %v2077_v16  ;;  %2084 = vst [vmem:[#allocation15] sm:$0xff] %v2077_v16 }
 0x847   :  { %3260 = shalt.err (!%p3257_p6)
}
 0x848   :  { %2096 = dma.vmem_to_hbm [thread:$0]  %s2091_s5, 1024, %s4550_s6, [#allocation5], %s3308_s0, %s3308_s0, %s3309_s24  }
 0x849   :  { %s3269_s13 = scalar_lea.vmem %s2104_s9, 128  ;;  %p3274_p8 = scmp.lt.s32.totalorder %s2104_s9, %s2104_s9 }
 0x84a   :  { %p3270_p7 = scmp.ne.s32.totalorder %s2104_s9, %s3269_s13  ;;  %p3275_p9 = scmp.lt.s32.totalorder %s3269_s13, %s3269_s13 }
 0x84c   :  { %p3276_p10 = por %p3275_p9, %p3274_p8 }
 0x84e   :  { %p3277_p11 = pnand %p3276_p10, %p3270_p7 }
 0x850   :  { %3280 = shalt.err (!%p3277_p11)
}
 0x851   :  { %2106 = dma.vmem_to_hbm [thread:$0]  %s2104_s9, 128, %s4551_s7, [#allocation16]  }
 0x852   :  { %3297 = dma.done.wait [#allocation5], 1024  }
 0x853   :  { %3298 = vsyncadd [#allocation5], 4294966272 }
 0x854   :  { %3299 = dma.done.wait [#allocation16], 128  }
 0x855   :  { %3300 = vsyncadd [#allocation16], 4294967168 }
 0x856   :  { %2113 = vsyncpa [#allocation4], 1 }
 0x857   :  { %2114 = vsyncpa [#allocation7], 1 }
 0x858   :  { %2115 = vsyncpa [#allocation10], 1 }
 0x859   :  { %2116 = vsyncpa [#allocation13], 1 }
 0x85a   :  { %2117 = vsyncpa [#allocation5], 1 }
 0x85b   :  { %2118 = vsyncpa [#allocation16], 1 }

</bundles_post_ra>
